<compile_context>
chip_gen: v5e
topology: v5e:2x2
jax: 0.10.0
libtpu: 0.0.40
codegen_flags: <defaults>
</compile_context>

<pallas_src>
import functools
import math

import jax
import jax.numpy as jnp
from jax.experimental import pallas as pl
from jax.experimental.pallas import tpu as pltpu


# ----------------------------- compiler params -----------------------------

def _pick_vmem_limit():
    # v5e/v6e: 128 MiB physical (16/32 MiB scoped default) -> raise to 96 MiB.
    # v7x: 64 MiB physical -> stay below it with headroom for internal scratch.
    try:
        cap = pltpu.get_tpu_info().vmem_capacity_bytes
    except Exception:
        cap = 64 << 20
    return int(max(min(cap - (16 << 20), 96 << 20), 32 << 20))


_VMEM_LIMIT = _pick_vmem_limit()


def _params(*dimension_semantics):
    return pltpu.CompilerParams(dimension_semantics=dimension_semantics,
                                vmem_limit_bytes=_VMEM_LIMIT)


def _tile(dim, cap):
    """Largest tile (multiple of 8, <= cap) dividing `dim`; else `dim` (full)."""
    for t in (512, 256, 128, 64, 32, 16, 8):
        if t <= cap and dim % t == 0:
            return t
    return dim


# ----------------------------- Pallas kernels -----------------------------

def _layernorm_kernel(x_ref, g_ref, b_ref, o_ref, *, eps):
    x = x_ref[...].astype(jnp.float32)
    mean = jnp.mean(x, axis=-1, keepdims=True)
    c = x - mean
    var = jnp.mean(c * c, axis=-1, keepdims=True)
    y = c * jax.lax.rsqrt(var + eps) * g_ref[...].astype(jnp.float32)
    o_ref[...] = (y + b_ref[...].astype(jnp.float32)).astype(o_ref.dtype)


def _dense_kernel(x_ref, w_ref, b_ref, o_ref):
    # bf16 x bf16 -> f32 accumulate on the MXU.
    y = jnp.dot(x_ref[...], w_ref[...], preferred_element_type=jnp.float32)
    o_ref[...] = (y + b_ref[...].astype(jnp.float32)).astype(o_ref.dtype)


def _dense_res_ln_kernel(x_ref, w_ref, b_ref, r_ref, g_ref, bb_ref, o_ref, *, eps):
    # Fused: (x @ w + b + residual) -> LayerNorm
    y = jnp.dot(x_ref[...], w_ref[...], preferred_element_type=jnp.float32)
    y = y + b_ref[...].astype(jnp.float32) + r_ref[...].astype(jnp.float32)
    mean = jnp.mean(y, axis=-1, keepdims=True)
    c = y - mean
    var = jnp.mean(c * c, axis=-1, keepdims=True)
    y = c * jax.lax.rsqrt(var + eps) * g_ref[...].astype(jnp.float32)
    o_ref[...] = (y + bb_ref[...].astype(jnp.float32)).astype(o_ref.dtype)


def _ffn_kernel(x_ref, wi_ref, bi_ref, wo_ref, bo_ref, g_ref, bb_ref, o_ref,
                acc_ref, *, eps):
    # Fused FFN, tiled over the intermediate dim (grid axis 1, "arbitrary"):
    #   acc += GELU(x @ wi[:, j] + bi[j]) @ wo[j, :]
    # last j step: acc + bo + x (residual) -> LayerNorm -> out.
    j = pl.program_id(1)

    @pl.when(j == 0)
    def _():
        acc_ref[...] = jnp.zeros_like(acc_ref)

    x = x_ref[...]
    h1 = jnp.dot(x, wi_ref[...], preferred_element_type=jnp.float32)
    h1 = h1 + bi_ref[...].astype(jnp.float32)
    h1 = 0.5 * h1 * (1.0 + jax.lax.erf(h1 * 0.7071067811865476))   # exact GELU (HF BERT)
    acc_ref[...] += jnp.dot(h1.astype(wo_ref.dtype), wo_ref[...],
                            preferred_element_type=jnp.float32)

    @pl.when(j == pl.num_programs(1) - 1)
    def _():
        y = acc_ref[...] + bo_ref[...].astype(jnp.float32) + x.astype(jnp.float32)
        mean = jnp.mean(y, axis=-1, keepdims=True)
        c = y - mean
        var = jnp.mean(c * c, axis=-1, keepdims=True)
        y = c * jax.lax.rsqrt(var + eps) * g_ref[...].astype(jnp.float32)
        o_ref[...] = (y + bb_ref[...].astype(jnp.float32)).astype(o_ref.dtype)


def _attention_kernel(q_ref, k_ref, v_ref, bias_ref, o_ref, *, scale):
    # One (sequence, head, q-tile) per grid step.
    # q block: (1, 1, tq, dh); k/v blocks: (1, 1, S, dh); bias: (1, 1, S).
    q = q_ref[0, 0] * scale                        # scale folded into (tq, dh)
    k = k_ref[0, 0]
    v = v_ref[0, 0]
    bias = bias_ref[0].astype(jnp.float32)         # (1, S) additive key mask
    # q @ k^T via dot_general: MXU consumes the transposed contraction natively
    # (no explicit (S, dh) -> (dh, S) transpose through the XLU).
    s = jax.lax.dot_general(q, k, (((1,), (1,)), ((), ())),
                            preferred_element_type=jnp.float32)    # (tq, S)
    s = s + bias
    # Note: a fully-masked row would give a uniform distribution over padding
    # (not NaN) — harmless here since the CLS key is always valid.
    m = jnp.max(s, axis=-1, keepdims=True)
    p = jnp.exp(s - m)
    denom = jnp.sum(p, axis=-1, keepdims=True)
    o = jnp.dot(p.astype(v.dtype), v, preferred_element_type=jnp.float32)
    o = o * pl.reciprocal(denom, approx=True)      # normalize the (tq, dh) output
    o_ref[0, 0] = o.astype(o_ref.dtype)


# ----------------------------- pallas_call wrappers -----------------------------

def layernorm(x, gamma, beta, eps, out_dtype=jnp.bfloat16):
    M, H = x.shape
    tm = _tile(M, 512)                             # mem-bound: biggest tile that fits
    kern = functools.partial(_layernorm_kernel, eps=eps)
    return pl.pallas_call(
        kern,
        out_shape=jax.ShapeDtypeStruct((M, H), out_dtype),
        grid=(M // tm,),
        in_specs=[
            pl.BlockSpec((tm, H), lambda i: (i, 0)),
            pl.BlockSpec((1, H), lambda i: (0, 0)),
            pl.BlockSpec((1, H), lambda i: (0, 0)),
        ],
        out_specs=pl.BlockSpec((tm, H), lambda i: (i, 0)),
        compiler_params=_params("parallel"),
    )(x, gamma, beta)


def dense(x, w, b, out_dtype=jnp.bfloat16):
    """y = x @ w + b (bf16 operands, f32 accumulation)."""
    M, K = x.shape
    N = w.shape[1]
    tm = _tile(M, 256)
    return pl.pallas_call(
        _dense_kernel,
        out_shape=jax.ShapeDtypeStruct((M, N), out_dtype),
        grid=(M // tm,),
        in_specs=[
            pl.BlockSpec((tm, K), lambda i: (i, 0)),
            pl.BlockSpec((K, N), lambda i: (0, 0)),
            pl.BlockSpec((1, N), lambda i: (0, 0)),
        ],
        out_specs=pl.BlockSpec((tm, N), lambda i: (i, 0)),
        compiler_params=_params("parallel"),
    )(x, w, b)


def dense_residual_layernorm(x, w, b, residual, gamma, beta, eps,
                             out_dtype=jnp.bfloat16):
    """LayerNorm(x @ w + b + residual), fused in one kernel."""
    M, K = x.shape
    N = w.shape[1]
    tm = _tile(M, 256)
    kern = functools.partial(_dense_res_ln_kernel, eps=eps)
    return pl.pallas_call(
        kern,
        out_shape=jax.ShapeDtypeStruct((M, N), out_dtype),
        grid=(M // tm,),
        in_specs=[
            pl.BlockSpec((tm, K), lambda i: (i, 0)),
            pl.BlockSpec((K, N), lambda i: (0, 0)),
            pl.BlockSpec((1, N), lambda i: (0, 0)),
            pl.BlockSpec((tm, N), lambda i: (i, 0)),
            pl.BlockSpec((1, N), lambda i: (0, 0)),
            pl.BlockSpec((1, N), lambda i: (0, 0)),
        ],
        out_specs=pl.BlockSpec((tm, N), lambda i: (i, 0)),
        compiler_params=_params("parallel"),
    )(x, w, b, residual, gamma, beta)


def ffn_residual_layernorm(x, wi, bi, wo, bo, gamma, beta, eps,
                           out_dtype=jnp.bfloat16):
    """LayerNorm(GELU(x @ wi + bi) @ wo + bo + x), tiled over the I dimension."""
    M, H = x.shape
    I = wi.shape[1]
    tm = _tile(M, 256)
    tI = _tile(I, 512)                             # bounds h1 to (tm, tI) f32
    kern = functools.partial(_ffn_kernel, eps=eps)
    return pl.pallas_call(
        kern,
        out_shape=jax.ShapeDtypeStruct((M, H), out_dtype),
        grid=(M // tm, I // tI),
        in_specs=[
            pl.BlockSpec((tm, H), lambda i, j: (i, 0)),
            pl.BlockSpec((H, tI), lambda i, j: (0, j)),
            pl.BlockSpec((1, tI), lambda i, j: (0, j)),
            pl.BlockSpec((tI, H), lambda i, j: (j, 0)),
            pl.BlockSpec((1, H), lambda i, j: (0, 0)),
            pl.BlockSpec((1, H), lambda i, j: (0, 0)),
            pl.BlockSpec((1, H), lambda i, j: (0, 0)),
        ],
        out_specs=pl.BlockSpec((tm, H), lambda i, j: (i, 0)),
        scratch_shapes=[pltpu.VMEM((tm, H), jnp.float32)],
        compiler_params=_params("parallel", "arbitrary"),
    )(x, wi, bi, wo, bo, gamma, beta)


def attention(q, k, v, attn_bias, scale, out_dtype=jnp.bfloat16):
    """Multi-head attention on head-major tensors.

    q/k/v: [B, nh, S, dh] bf16, attn_bias: [B, 1, S] f32 additive key mask.
    Grid: (batch, head, q-tile) — all parallel (feeds v7x's 2 TCs / megacore).
    """
    B, nh, S, dh = q.shape
    tq = _tile(S, 256)
    kern = functools.partial(_attention_kernel, scale=scale)
    return pl.pallas_call(
        kern,
        out_shape=jax.ShapeDtypeStruct((B, nh, S, dh), out_dtype),
        grid=(B, nh, S // tq),
        in_specs=[
            pl.BlockSpec((1, 1, tq, dh), lambda b, h, qi: (b, h, qi, 0)),
            pl.BlockSpec((1, 1, S, dh), lambda b, h, qi: (b, h, 0, 0)),
            pl.BlockSpec((1, 1, S, dh), lambda b, h, qi: (b, h, 0, 0)),
            pl.BlockSpec((1, 1, S), lambda b, h, qi: (b, 0, 0)),
        ],
        out_specs=pl.BlockSpec((1, 1, tq, dh), lambda b, h, qi: (b, h, qi, 0)),
        compiler_params=_params("parallel", "parallel", "parallel"),
    )(q, k, v, attn_bias)


# ----------------------------- parameter setup -----------------------------

CFG = dict(vocab=50, type_vocab=2, max_pos=16, hidden=32, heads=2,
           layers=2, intermediate=64, num_labels=4, eps=1e-12)


def init_params(key, cfg):
    H, I = cfg["hidden"], cfg["intermediate"]
    ks = iter(jax.random.split(key, 64))
    n = lambda shape, s=0.02: (jax.random.normal(next(ks), shape, jnp.float32) * s)

    params = {
        "word_emb": n((cfg["vocab"], H)),
        "pos_emb": n((cfg["max_pos"], H)),
        "type_emb": n((cfg["type_vocab"], H)),
        "emb_ln_g": jnp.ones((H,), jnp.float32),
        "emb_ln_b": jnp.zeros((H,), jnp.float32),
        "layers": [],
    }
    for _ in range(cfg["layers"]):
        params["layers"].append(dict(
            wq=n((H, H)), bq=jnp.zeros((H,), jnp.float32),
            wk=n((H, H)), bk=jnp.zeros((H,), jnp.float32),
            wv=n((H, H)), bv=jnp.zeros((H,), jnp.float32),
            wo=n((H, H)), bo=jnp.zeros((H,), jnp.float32),
            ln1_g=jnp.ones((H,), jnp.float32), ln1_b=jnp.zeros((H,), jnp.float32),
            wi=n((H, I)), bi=jnp.zeros((I,), jnp.float32),
            wo2=n((I, H)), bo2=jnp.zeros((H,), jnp.float32),
            ln2_g=jnp.ones((H,), jnp.float32), ln2_b=jnp.zeros((H,), jnp.float32),
        ))
    # MLP head: Xavier-uniform weight, bias filled with 0.01 (matches init_weights)
    limit = math.sqrt(6.0 / (H + cfg["num_labels"]))
    params["mlp_w"] = jax.random.uniform(next(ks), (H, cfg["num_labels"]),
                                         jnp.float32, -limit, limit)
    params["mlp_b"] = jnp.full((cfg["num_labels"],), 0.01, jnp.float32)
    return params


def prepare_params(params, cfg):
    """Fuse QKV weights, cast matmul operands to bf16, reshape biases to (1, N)."""
    H, I = cfg["hidden"], cfg["intermediate"]
    bf = jnp.bfloat16
    p = {
        "word_emb": params["word_emb"],
        "pos_emb": params["pos_emb"],
        "type_emb": params["type_emb"],
        "emb_ln_g": params["emb_ln_g"].reshape(1, H),
        "emb_ln_b": params["emb_ln_b"].reshape(1, H),
        "mlp_w": params["mlp_w"],
        "mlp_b": params["mlp_b"],
        "layers": [],
    }
    for lyr in params["layers"]:
        p["layers"].append(dict(
            w_qkv=jnp.concatenate([lyr["wq"], lyr["wk"], lyr["wv"]], axis=1).astype(bf),
            b_qkv=jnp.concatenate([lyr["bq"], lyr["bk"], lyr["bv"]]).reshape(1, 3 * H),
            wo=lyr["wo"].astype(bf), bo=lyr["bo"].reshape(1, H),
            ln1_g=lyr["ln1_g"].reshape(1, H), ln1_b=lyr["ln1_b"].reshape(1, H),
            wi=lyr["wi"].astype(bf), bi=lyr["bi"].reshape(1, I),
            wo2=lyr["wo2"].astype(bf), bo2=lyr["bo2"].reshape(1, H),
            ln2_g=lyr["ln2_g"].reshape(1, H), ln2_b=lyr["ln2_b"].reshape(1, H),
        ))
    return p


# ----------------------------- model forward -----------------------------

def bert_forward(p, input_ids, token_type_ids, attention_mask, cfg):
    """One BERT encoder pass over already chunk-folded inputs [B*C, S]."""
    B, S = input_ids.shape
    H = cfg["hidden"]
    nh = cfg["heads"]
    dh = H // nh
    M = B * S

    # embedding gathers are glue (tiny tables) — done in XLA
    emb = (p["word_emb"][input_ids]
           + p["pos_emb"][jnp.arange(S)][None, :, :]
           + p["type_emb"][token_type_ids])                       # f32 [B, S, H]
    x = layernorm(emb.reshape(M, H), p["emb_ln_g"], p["emb_ln_b"], cfg["eps"])

    attn_bias = ((1.0 - attention_mask.astype(jnp.float32)) * -1e9).reshape(B, 1, S)
    scale = 1.0 / math.sqrt(dh)

    for lyr in p["layers"]:
        qkv = dense(x, lyr["w_qkv"], lyr["b_qkv"])                # [M, 3H] bf16
        # head-major layout plumbing in XLA (bf16), lane-dense (S, dh) blocks
        qkv_h = jnp.transpose(qkv.reshape(B, S, 3, nh, dh), (2, 0, 3, 1, 4))
        ctx = attention(qkv_h[0], qkv_h[1], qkv_h[2], attn_bias, scale)
        ctx = jnp.transpose(ctx, (0, 2, 1, 3)).reshape(M, H)      # merge heads
        x = dense_residual_layernorm(ctx, lyr["wo"], lyr["bo"],
                                     x, lyr["ln1_g"], lyr["ln1_b"], cfg["eps"])
        x = ffn_residual_layernorm(x, lyr["wi"], lyr["bi"], lyr["wo2"], lyr["bo2"],
                                   lyr["ln2_g"], lyr["ln2_b"], cfg["eps"])

    return x.reshape(B, S, H)                                     # last_hidden_state


def mainplm_forward(p, input_ids, attention_mask, token_type_ids, cfg):
    B, C, S = input_ids.shape
    H = cfg["hidden"]
    # Fold chunks into the batch: one forward instead of a Python chunk loop.
    hidden = bert_forward(p,
                          input_ids.reshape(B * C, S),
                          token_type_ids.reshape(B * C, S),
                          attention_mask.reshape(B * C, S),
                          cfg)                                    # [B*C, S, H] bf16
    cls = hidden[:, 0, :].astype(jnp.float32).reshape(B, C, H)
    cls = jnp.mean(cls, axis=1)       # mean over chunks (incl. padded ones — matches reference)
    # nn.Dropout(p=0.1) is identity at inference.
    # Classifier head is lane-sparse (N=4): plain XLA matmul, not worth a kernel.
    return cls @ p["mlp_w"] + p["mlp_b"]


# ----------------------------- main -----------------------------

if __name__ == "__main__":
    key = jax.random.PRNGKey(0)
    k_param, k_ids, k_type = jax.random.split(key, 3)

    params = prepare_params(init_params(k_param, CFG), CFG)

    batch, num_chunks, seq = 2, 2, 8
    input_ids = jax.random.randint(k_ids, (batch, num_chunks, seq), 0, CFG["vocab"],
                                   dtype=jnp.int32)
    token_type_ids = jax.random.randint(k_type, (batch, num_chunks, seq), 0,
                                        CFG["type_vocab"], dtype=jnp.int32)
    attention_mask = jnp.ones((batch, num_chunks, seq), jnp.int32)
    # make the last two positions of every second chunk padding, to exercise the mask
    attention_mask = attention_mask.at[:, -1, -2:].set(0)

    fwd = jax.jit(functools.partial(mainplm_forward, cfg=CFG))
    out = fwd(params, input_ids, attention_mask, token_type_ids)
    out = jax.block_until_ready(out)

    assert out.shape == (batch, CFG["num_labels"])
    assert bool(jnp.all(jnp.isfinite(out.astype(jnp.float32))))
    print("KERNEL_OK")
</pallas_src>

<mosaic_0001>
module attributes {stable_mosaic.version = 11 : i64} {
  func.func @_layernorm_kernel(%arg0: i32, %arg1: memref<32x32xf32, #tpu.memory_space<vmem>>, %arg2: memref<1x32xf32, #tpu.memory_space<vmem>>, %arg3: memref<1x32xf32, #tpu.memory_space<vmem>>, %arg4: memref<32x32xbf16, #tpu.memory_space<vmem>>) attributes {dimension_semantics = [#tpu.dimension_semantics<parallel>], iteration_bounds = array<i64: 1>, scalar_prefetch = 0 : i64, scratch_operands = 0 : i64, tpu.core_type = #tpu.core_type<tc>, window_params = [{transform_indices = @transform_0, window_bounds = array<i64: 32, 32>}, {pipeline_mode = #tpu.pipeline_mode<synchronous>, transform_indices = @transform_1, window_bounds = array<i64: 1, 32>}, {pipeline_mode = #tpu.pipeline_mode<synchronous>, transform_indices = @transform_2, window_bounds = array<i64: 1, 32>}, {transform_indices = @transform_3, window_bounds = array<i64: 32, 32>}]} {
    %c0 = arith.constant 0 : index
    %c0_0 = arith.constant 0 : index
    %0 = vector.load %arg1[%c0, %c0_0] : memref<32x32xf32, #tpu.memory_space<vmem>>, vector<32x32xf32>
    %cst = arith.constant dense<0.000000e+00> : vector<32xf32>
    %1 = vector.multi_reduction <add>, %0, %cst [1] : vector<32x32xf32> to vector<32xf32>
    %2 = vector.shape_cast %1 : vector<32xf32> to vector<32x1xf32>
    %cst_1 = arith.constant 3.200000e+01 : f32
    %3 = vector.broadcast %cst_1 : f32 to vector<32x1xf32>
    %4 = arith.divf %2, %3 : vector<32x1xf32>
    %5 = vector.broadcast %4 : vector<32x1xf32> to vector<32x32xf32>
    %6 = arith.subf %0, %5 : vector<32x32xf32>
    %7 = arith.mulf %6, %6 : vector<32x32xf32>
    %cst_2 = arith.constant dense<0.000000e+00> : vector<32xf32>
    %8 = vector.multi_reduction <add>, %7, %cst_2 [1] : vector<32x32xf32> to vector<32xf32>
    %9 = vector.shape_cast %8 : vector<32xf32> to vector<32x1xf32>
    %cst_3 = arith.constant 3.200000e+01 : f32
    %10 = vector.broadcast %cst_3 : f32 to vector<32x1xf32>
    %11 = arith.divf %9, %10 : vector<32x1xf32>
    %cst_4 = arith.constant 9.99999996E-13 : f32
    %12 = vector.broadcast %cst_4 : f32 to vector<32x1xf32>
    %13 = arith.addf %11, %12 : vector<32x1xf32>
    %14 = math.rsqrt %13 : vector<32x1xf32>
    %15 = vector.broadcast %14 : vector<32x1xf32> to vector<32x32xf32>
    %16 = arith.mulf %6, %15 : vector<32x32xf32>
    %c0_5 = arith.constant 0 : index
    %c0_6 = arith.constant 0 : index
    %17 = vector.load %arg2[%c0_5, %c0_6] : memref<1x32xf32, #tpu.memory_space<vmem>>, vector<1x32xf32>
    %18 = vector.broadcast %17 : vector<1x32xf32> to vector<32x32xf32>
    %19 = arith.mulf %16, %18 : vector<32x32xf32>
    %c0_7 = arith.constant 0 : index
    %c0_8 = arith.constant 0 : index
    %20 = vector.load %arg3[%c0_7, %c0_8] : memref<1x32xf32, #tpu.memory_space<vmem>>, vector<1x32xf32>
    %21 = vector.broadcast %20 : vector<1x32xf32> to vector<32x32xf32>
    %22 = arith.addf %19, %21 : vector<32x32xf32>
    %23 = arith.truncf %22 : vector<32x32xf32> to vector<32x32xbf16>
    %c0_9 = arith.constant 0 : index
    %c0_10 = arith.constant 0 : index
    %24 = vector.load %arg4[%c0_9, %c0_10] : memref<32x32xbf16, #tpu.memory_space<vmem>>, vector<32x32xbf16>
    tpu.vector_store %arg4[%c0_9, %c0_10], %23 {strides = array<i32>} : memref<32x32xbf16, #tpu.memory_space<vmem>>, vector<32x32xbf16>,
    return
  }
  func.func @transform_0(%arg0: i32) -> (i32, i32) {
    %c0_i32 = arith.constant 0 : i32
    %c0_i32_0 = arith.constant 0 : i32
    return %arg0, %c0_i32 : i32, i32
  }
  func.func @transform_1(%arg0: i32) -> (i32, i32) {
    %c0_i32 = arith.constant 0 : i32
    %c0_i32_0 = arith.constant 0 : i32
    %c0_i32_1 = arith.constant 0 : i32
    return %c0_i32, %c0_i32_0 : i32, i32
  }
  func.func @transform_2(%arg0: i32) -> (i32, i32) {
    %c0_i32 = arith.constant 0 : i32
    %c0_i32_0 = arith.constant 0 : i32
    %c0_i32_1 = arith.constant 0 : i32
    return %c0_i32, %c0_i32_0 : i32, i32
  }
  func.func @transform_3(%arg0: i32) -> (i32, i32) {
    %c0_i32 = arith.constant 0 : i32
    %c0_i32_0 = arith.constant 0 : i32
    return %arg0, %c0_i32 : i32, i32
  }
}

module attributes {stable_mosaic.version = 11 : i64} {
  func.func @_dense_kernel(%arg0: i32, %arg1: memref<32x32xbf16, #tpu.memory_space<vmem>>, %arg2: memref<32x96xbf16, #tpu.memory_space<vmem>>, %arg3: memref<1x96xf32, #tpu.memory_space<vmem>>, %arg4: memref<32x96xbf16, #tpu.memory_space<vmem>>) attributes {dimension_semantics = [#tpu.dimension_semantics<parallel>], iteration_bounds = array<i64: 1>, scalar_prefetch = 0 : i64, scratch_operands = 0 : i64, tpu.core_type = #tpu.core_type<tc>, window_params = [{transform_indices = @transform_0, window_bounds = array<i64: 32, 32>}, {pipeline_mode = #tpu.pipeline_mode<synchronous>, transform_indices = @transform_1, window_bounds = array<i64: 32, 96>}, {pipeline_mode = #tpu.pipeline_mode<synchronous>, transform_indices = @transform_2, window_bounds = array<i64: 1, 96>}, {transform_indices = @transform_3, window_bounds = array<i64: 32, 96>}]} {
    %c0 = arith.constant 0 : index
    %c0_0 = arith.constant 0 : index
    %0 = vector.load %arg1[%c0, %c0_0] : memref<32x32xbf16, #tpu.memory_space<vmem>>, vector<32x32xbf16>
    %c0_1 = arith.constant 0 : index
    %c0_2 = arith.constant 0 : index
    %1 = vector.load %arg2[%c0_1, %c0_2] : memref<32x96xbf16, #tpu.memory_space<vmem>>, vector<32x96xbf16>
    %cst = arith.constant dense<0.000000e+00> : vector<32x96xf32>
    %2 = tpu.matmul %0, %1, %cst {dimension_numbers = #tpu.dot_dimension_numbers<[1], [0], [0], [1], [0, 0, 1, 1], [], []>} : vector<32x32xbf16>, vector<32x96xbf16>, vector<32x96xf32> -> vector<32x96xf32>
    %c0_3 = arith.constant 0 : index
    %c0_4 = arith.constant 0 : index
    %3 = vector.load %arg3[%c0_3, %c0_4] : memref<1x96xf32, #tpu.memory_space<vmem>>, vector<1x96xf32>
    %4 = vector.broadcast %3 : vector<1x96xf32> to vector<32x96xf32>
    %5 = arith.addf %2, %4 : vector<32x96xf32>
    %6 = arith.truncf %5 : vector<32x96xf32> to vector<32x96xbf16>
    %c0_5 = arith.constant 0 : index
    %c0_6 = arith.constant 0 : index
    %7 = vector.load %arg4[%c0_5, %c0_6] : memref<32x96xbf16, #tpu.memory_space<vmem>>, vector<32x96xbf16>
    tpu.vector_store %arg4[%c0_5, %c0_6], %6 {strides = array<i32>} : memref<32x96xbf16, #tpu.memory_space<vmem>>, vector<32x96xbf16>,
    return
  }
  func.func @transform_0(%arg0: i32) -> (i32, i32) {
    %c0_i32 = arith.constant 0 : i32
    %c0_i32_0 = arith.constant 0 : i32
    return %arg0, %c0_i32 : i32, i32
  }
  func.func @transform_1(%arg0: i32) -> (i32, i32) {
    %c0_i32 = arith.constant 0 : i32
    %c0_i32_0 = arith.constant 0 : i32
    %c0_i32_1 = arith.constant 0 : i32
    return %c0_i32, %c0_i32_0 : i32, i32
  }
  func.func @transform_2(%arg0: i32) -> (i32, i32) {
    %c0_i32 = arith.constant 0 : i32
    %c0_i32_0 = arith.constant 0 : i32
    %c0_i32_1 = arith.constant 0 : i32
    return %c0_i32, %c0_i32_0 : i32, i32
  }
  func.func @transform_3(%arg0: i32) -> (i32, i32) {
    %c0_i32 = arith.constant 0 : i32
    %c0_i32_0 = arith.constant 0 : i32
    return %arg0, %c0_i32 : i32, i32
  }
}

module attributes {stable_mosaic.version = 11 : i64} {
  func.func @_attention_kernel(%arg0: i32, %arg1: i32, %arg2: i32, %arg3: memref<1x1x8x16xbf16, #tpu.memory_space<vmem>>, %arg4: memref<1x1x8x16xbf16, #tpu.memory_space<vmem>>, %arg5: memref<1x1x8x16xbf16, #tpu.memory_space<vmem>>, %arg6: memref<1x1x8xf32, #tpu.memory_space<vmem>>, %arg7: memref<1x1x8x16xbf16, #tpu.memory_space<vmem>>) attributes {dimension_semantics = [#tpu.dimension_semantics<parallel>, #tpu.dimension_semantics<parallel>, #tpu.dimension_semantics<parallel>], iteration_bounds = array<i64: 4, 2, 1>, scalar_prefetch = 0 : i64, scratch_operands = 0 : i64, tpu.core_type = #tpu.core_type<tc>, window_params = [{transform_indices = @transform_0, window_bounds = array<i64: 1, 1, 8, 16>}, {transform_indices = @transform_1, window_bounds = array<i64: 1, 1, 8, 16>}, {transform_indices = @transform_2, window_bounds = array<i64: 1, 1, 8, 16>}, {transform_indices = @transform_3, window_bounds = array<i64: 1, 1, 8>}, {transform_indices = @transform_4, window_bounds = array<i64: 1, 1, 8, 16>}]} {
    %c0 = arith.constant 0 : index
    %c0_0 = arith.constant 0 : index
    %c0_1 = arith.constant 0 : index
    %c0_2 = arith.constant 0 : index
    %0 = vector.load %arg3[%c0, %c0_0, %c0_1, %c0_2] : memref<1x1x8x16xbf16, #tpu.memory_space<vmem>>, vector<1x1x8x16xbf16>
    %1 = vector.shape_cast %0 : vector<1x1x8x16xbf16> to vector<8x16xbf16>
    %cst = arith.constant 2.500000e-01 : bf16
    %2 = vector.broadcast %cst : bf16 to vector<8x16xbf16>
    %3 = arith.mulf %1, %2 : vector<8x16xbf16>
    %c0_3 = arith.constant 0 : index
    %c0_4 = arith.constant 0 : index
    %c0_5 = arith.constant 0 : index
    %c0_6 = arith.constant 0 : index
    %4 = vector.load %arg4[%c0_3, %c0_4, %c0_5, %c0_6] : memref<1x1x8x16xbf16, #tpu.memory_space<vmem>>, vector<1x1x8x16xbf16>
    %5 = vector.shape_cast %4 : vector<1x1x8x16xbf16> to vector<8x16xbf16>
    %c0_7 = arith.constant 0 : index
    %c0_8 = arith.constant 0 : index
    %c0_9 = arith.constant 0 : index
    %c0_10 = arith.constant 0 : index
    %6 = vector.load %arg5[%c0_7, %c0_8, %c0_9, %c0_10] : memref<1x1x8x16xbf16, #tpu.memory_space<vmem>>, vector<1x1x8x16xbf16>
    %7 = vector.shape_cast %6 : vector<1x1x8x16xbf16> to vector<8x16xbf16>
    %c0_11 = arith.constant 0 : index
    %c0_12 = arith.constant 0 : index
    %c0_13 = arith.constant 0 : index
    %8 = vector.load %arg6[%c0_11, %c0_12, %c0_13] : memref<1x1x8xf32, #tpu.memory_space<vmem>>, vector<1x1x8xf32>
    %9 = vector.shape_cast %8 : vector<1x1x8xf32> to vector<1x8xf32>
    %cst_14 = arith.constant dense<0.000000e+00> : vector<8x8xf32>
    %10 = tpu.matmul %3, %5, %cst_14 {dimension_numbers = #tpu.dot_dimension_numbers<[1], [1], [0], [0], [0, 0, 1, 0], [], []>} : vector<8x16xbf16>, vector<8x16xbf16>, vector<8x8xf32> -> vector<8x8xf32>
    %11 = vector.broadcast %9 : vector<1x8xf32> to vector<8x8xf32>
    %12 = arith.addf %10, %11 : vector<8x8xf32>
    %cst_15 = arith.constant dense<0xFF800000> : vector<8xf32>
    %13 = vector.multi_reduction <maximumf>, %12, %cst_15 [1] : vector<8x8xf32> to vector<8xf32>
    %14 = vector.shape_cast %13 : vector<8xf32> to vector<8x1xf32>
    %15 = vector.broadcast %14 : vector<8x1xf32> to vector<8x8xf32>
    %16 = arith.subf %12, %15 : vector<8x8xf32>
    %17 = math.exp %16 : vector<8x8xf32>
    %cst_16 = arith.constant dense<0.000000e+00> : vector<8xf32>
    %18 = vector.multi_reduction <add>, %17, %cst_16 [1] : vector<8x8xf32> to vector<8xf32>
    %19 = vector.shape_cast %18 : vector<8xf32> to vector<8x1xf32>
    %20 = arith.truncf %17 : vector<8x8xf32> to vector<8x8xbf16>
    %cst_17 = arith.constant dense<0.000000e+00> : vector<8x16xf32>
    %21 = tpu.matmul %20, %7, %cst_17 {dimension_numbers = #tpu.dot_dimension_numbers<[1], [0], [0], [1], [0, 0, 1, 1], [], []>} : vector<8x8xbf16>, vector<8x16xbf16>, vector<8x16xf32> -> vector<8x16xf32>
    %22 = tpu.reciprocal %19 {approx = true} : vector<8x1xf32> -> vector<8x1xf32>
    %23 = vector.broadcast %22 : vector<8x1xf32> to vector<8x16xf32>
    %24 = arith.mulf %21, %23 : vector<8x16xf32>
    %25 = arith.truncf %24 : vector<8x16xf32> to vector<8x16xbf16>
    %c0_18 = arith.constant 0 : index
    %c0_19 = arith.constant 0 : index
    %c0_20 = arith.constant 0 : index
    %c0_21 = arith.constant 0 : index
    %26 = vector.load %arg7[%c0_18, %c0_19, %c0_20, %c0_21] : memref<1x1x8x16xbf16, #tpu.memory_space<vmem>>, vector<1x1x8x16xbf16>
    %27 = vector.shape_cast %26 : vector<1x1x8x16xbf16> to vector<8x16xbf16>
    %28 = vector.shape_cast %25 : vector<8x16xbf16> to vector<1x1x8x16xbf16>
    tpu.vector_store %arg7[%c0_18, %c0_19, %c0_20, %c0_21], %28 {strides = array<i32>} : memref<1x1x8x16xbf16, #tpu.memory_space<vmem>>, vector<1x1x8x16xbf16>,
    return
  }
  func.func @transform_0(%arg0: i32, %arg1: i32, %arg2: i32) -> (i32, i32, i32, i32) {
    %c0_i32 = arith.constant 0 : i32
    %c0_i32_0 = arith.constant 0 : i32
    return %arg0, %arg1, %arg2, %c0_i32 : i32, i32, i32, i32
  }
  func.func @transform_1(%arg0: i32, %arg1: i32, %arg2: i32) -> (i32, i32, i32, i32) {
    %c0_i32 = arith.constant 0 : i32
    %c0_i32_0 = arith.constant 0 : i32
    %c0_i32_1 = arith.constant 0 : i32
    return %arg0, %arg1, %c0_i32, %c0_i32_0 : i32, i32, i32, i32
  }
  func.func @transform_2(%arg0: i32, %arg1: i32, %arg2: i32) -> (i32, i32, i32, i32) {
    %c0_i32 = arith.constant 0 : i32
    %c0_i32_0 = arith.constant 0 : i32
    %c0_i32_1 = arith.constant 0 : i32
    return %arg0, %arg1, %c0_i32, %c0_i32_0 : i32, i32, i32, i32
  }
  func.func @transform_3(%arg0: i32, %arg1: i32, %arg2: i32) -> (i32, i32, i32) {
    %c0_i32 = arith.constant 0 : i32
    %c0_i32_0 = arith.constant 0 : i32
    %c0_i32_1 = arith.constant 0 : i32
    return %arg0, %c0_i32, %c0_i32_0 : i32, i32, i32
  }
  func.func @transform_4(%arg0: i32, %arg1: i32, %arg2: i32) -> (i32, i32, i32, i32) {
    %c0_i32 = arith.constant 0 : i32
    %c0_i32_0 = arith.constant 0 : i32
    return %arg0, %arg1, %arg2, %c0_i32 : i32, i32, i32, i32
  }
}

module attributes {stable_mosaic.version = 11 : i64} {
  func.func @_dense_res_ln_kernel(%arg0: i32, %arg1: memref<32x32xbf16, #tpu.memory_space<vmem>>, %arg2: memref<32x32xbf16, #tpu.memory_space<vmem>>, %arg3: memref<1x32xf32, #tpu.memory_space<vmem>>, %arg4: memref<32x32xbf16, #tpu.memory_space<vmem>>, %arg5: memref<1x32xf32, #tpu.memory_space<vmem>>, %arg6: memref<1x32xf32, #tpu.memory_space<vmem>>, %arg7: memref<32x32xbf16, #tpu.memory_space<vmem>>) attributes {dimension_semantics = [#tpu.dimension_semantics<parallel>], iteration_bounds = array<i64: 1>, scalar_prefetch = 0 : i64, scratch_operands = 0 : i64, tpu.core_type = #tpu.core_type<tc>, window_params = [{transform_indices = @transform_0, window_bounds = array<i64: 32, 32>}, {pipeline_mode = #tpu.pipeline_mode<synchronous>, transform_indices = @transform_1, window_bounds = array<i64: 32, 32>}, {pipeline_mode = #tpu.pipeline_mode<synchronous>, transform_indices = @transform_2, window_bounds = array<i64: 1, 32>}, {transform_indices = @transform_3, window_bounds = array<i64: 32, 32>}, {pipeline_mode = #tpu.pipeline_mode<synchronous>, transform_indices = @transform_4, window_bounds = array<i64: 1, 32>}, {pipeline_mode = #tpu.pipeline_mode<synchronous>, transform_indices = @transform_5, window_bounds = array<i64: 1, 32>}, {transform_indices = @transform_6, window_bounds = array<i64: 32, 32>}]} {
    %c0 = arith.constant 0 : index
    %c0_0 = arith.constant 0 : index
    %0 = vector.load %arg1[%c0, %c0_0] : memref<32x32xbf16, #tpu.memory_space<vmem>>, vector<32x32xbf16>
    %c0_1 = arith.constant 0 : index
    %c0_2 = arith.constant 0 : index
    %1 = vector.load %arg2[%c0_1, %c0_2] : memref<32x32xbf16, #tpu.memory_space<vmem>>, vector<32x32xbf16>
    %cst = arith.constant dense<0.000000e+00> : vector<32x32xf32>
    %2 = tpu.matmul %0, %1, %cst {dimension_numbers = #tpu.dot_dimension_numbers<[1], [0], [0], [1], [0, 0, 1, 1], [], []>} : vector<32x32xbf16>, vector<32x32xbf16>, vector<32x32xf32> -> vector<32x32xf32>
    %c0_3 = arith.constant 0 : index
    %c0_4 = arith.constant 0 : index
    %3 = vector.load %arg3[%c0_3, %c0_4] : memref<1x32xf32, #tpu.memory_space<vmem>>, vector<1x32xf32>
    %4 = vector.broadcast %3 : vector<1x32xf32> to vector<32x32xf32>
    %5 = arith.addf %2, %4 : vector<32x32xf32>
    %c0_5 = arith.constant 0 : index
    %c0_6 = arith.constant 0 : index
    %6 = vector.load %arg4[%c0_5, %c0_6] : memref<32x32xbf16, #tpu.memory_space<vmem>>, vector<32x32xbf16>
    %7 = arith.extf %6 : vector<32x32xbf16> to vector<32x32xf32>
    %8 = arith.addf %5, %7 : vector<32x32xf32>
    %cst_7 = arith.constant dense<0.000000e+00> : vector<32xf32>
    %9 = vector.multi_reduction <add>, %8, %cst_7 [1] : vector<32x32xf32> to vector<32xf32>
    %10 = vector.shape_cast %9 : vector<32xf32> to vector<32x1xf32>
    %cst_8 = arith.constant 3.200000e+01 : f32
    %11 = vector.broadcast %cst_8 : f32 to vector<32x1xf32>
    %12 = arith.divf %10, %11 : vector<32x1xf32>
    %13 = vector.broadcast %12 : vector<32x1xf32> to vector<32x32xf32>
    %14 = arith.subf %8, %13 : vector<32x32xf32>
    %15 = arith.mulf %14, %14 : vector<32x32xf32>
    %cst_9 = arith.constant dense<0.000000e+00> : vector<32xf32>
    %16 = vector.multi_reduction <add>, %15, %cst_9 [1] : vector<32x32xf32> to vector<32xf32>
    %17 = vector.shape_cast %16 : vector<32xf32> to vector<32x1xf32>
    %cst_10 = arith.constant 3.200000e+01 : f32
    %18 = vector.broadcast %cst_10 : f32 to vector<32x1xf32>
    %19 = arith.divf %17, %18 : vector<32x1xf32>
    %cst_11 = arith.constant 9.99999996E-13 : f32
    %20 = vector.broadcast %cst_11 : f32 to vector<32x1xf32>
    %21 = arith.addf %19, %20 : vector<32x1xf32>
    %22 = math.rsqrt %21 : vector<32x1xf32>
    %23 = vector.broadcast %22 : vector<32x1xf32> to vector<32x32xf32>
    %24 = arith.mulf %14, %23 : vector<32x32xf32>
    %c0_12 = arith.constant 0 : index
    %c0_13 = arith.constant 0 : index
    %25 = vector.load %arg5[%c0_12, %c0_13] : memref<1x32xf32, #tpu.memory_space<vmem>>, vector<1x32xf32>
    %26 = vector.broadcast %25 : vector<1x32xf32> to vector<32x32xf32>
    %27 = arith.mulf %24, %26 : vector<32x32xf32>
    %c0_14 = arith.constant 0 : index
    %c0_15 = arith.constant 0 : index
    %28 = vector.load %arg6[%c0_14, %c0_15] : memref<1x32xf32, #tpu.memory_space<vmem>>, vector<1x32xf32>
    %29 = vector.broadcast %28 : vector<1x32xf32> to vector<32x32xf32>
    %30 = arith.addf %27, %29 : vector<32x32xf32>
    %31 = arith.truncf %30 : vector<32x32xf32> to vector<32x32xbf16>
    %c0_16 = arith.constant 0 : index
    %c0_17 = arith.constant 0 : index
    %32 = vector.load %arg7[%c0_16, %c0_17] : memref<32x32xbf16, #tpu.memory_space<vmem>>, vector<32x32xbf16>
    tpu.vector_store %arg7[%c0_16, %c0_17], %31 {strides = array<i32>} : memref<32x32xbf16, #tpu.memory_space<vmem>>, vector<32x32xbf16>,
    return
  }
  func.func @transform_0(%arg0: i32) -> (i32, i32) {
    %c0_i32 = arith.constant 0 : i32
    %c0_i32_0 = arith.constant 0 : i32
    return %arg0, %c0_i32 : i32, i32
  }
  func.func @transform_1(%arg0: i32) -> (i32, i32) {
    %c0_i32 = arith.constant 0 : i32
    %c0_i32_0 = arith.constant 0 : i32
    %c0_i32_1 = arith.constant 0 : i32
    return %c0_i32, %c0_i32_0 : i32, i32
  }
  func.func @transform_2(%arg0: i32) -> (i32, i32) {
    %c0_i32 = arith.constant 0 : i32
    %c0_i32_0 = arith.constant 0 : i32
    %c0_i32_1 = arith.constant 0 : i32
    return %c0_i32, %c0_i32_0 : i32, i32
  }
  func.func @transform_3(%arg0: i32) -> (i32, i32) {
    %c0_i32 = arith.constant 0 : i32
    %c0_i32_0 = arith.constant 0 : i32
    return %arg0, %c0_i32 : i32, i32
  }
  func.func @transform_4(%arg0: i32) -> (i32, i32) {
    %c0_i32 = arith.constant 0 : i32
    %c0_i32_0 = arith.constant 0 : i32
    %c0_i32_1 = arith.constant 0 : i32
    return %c0_i32, %c0_i32_0 : i32, i32
  }
  func.func @transform_5(%arg0: i32) -> (i32, i32) {
    %c0_i32 = arith.constant 0 : i32
    %c0_i32_0 = arith.constant 0 : i32
    %c0_i32_1 = arith.constant 0 : i32
    return %c0_i32, %c0_i32_0 : i32, i32
  }
  func.func @transform_6(%arg0: i32) -> (i32, i32) {
    %c0_i32 = arith.constant 0 : i32
    %c0_i32_0 = arith.constant 0 : i32
    return %arg0, %c0_i32 : i32, i32
  }
}

module attributes {stable_mosaic.version = 11 : i64} {
  func.func @_ffn_kernel(%arg0: i32, %arg1: i32, %arg2: memref<32x32xbf16, #tpu.memory_space<vmem>>, %arg3: memref<32x64xbf16, #tpu.memory_space<vmem>>, %arg4: memref<1x64xf32, #tpu.memory_space<vmem>>, %arg5: memref<64x32xbf16, #tpu.memory_space<vmem>>, %arg6: memref<1x32xf32, #tpu.memory_space<vmem>>, %arg7: memref<1x32xf32, #tpu.memory_space<vmem>>, %arg8: memref<1x32xf32, #tpu.memory_space<vmem>>, %arg9: memref<32x32xbf16, #tpu.memory_space<vmem>>, %arg10: memref<32x32xf32, #tpu.memory_space<vmem>>) attributes {dimension_semantics = [#tpu.dimension_semantics<parallel>, #tpu.dimension_semantics<arbitrary>], iteration_bounds = array<i64: 1, 1>, scalar_prefetch = 0 : i64, scratch_operands = 1 : i64, tpu.core_type = #tpu.core_type<tc>, window_params = [{transform_indices = @transform_0, window_bounds = array<i64: 32, 32>}, {transform_indices = @transform_1, window_bounds = array<i64: 32, 64>}, {transform_indices = @transform_2, window_bounds = array<i64: 1, 64>}, {transform_indices = @transform_3, window_bounds = array<i64: 64, 32>}, {pipeline_mode = #tpu.pipeline_mode<synchronous>, transform_indices = @transform_4, window_bounds = array<i64: 1, 32>}, {pipeline_mode = #tpu.pipeline_mode<synchronous>, transform_indices = @transform_5, window_bounds = array<i64: 1, 32>}, {pipeline_mode = #tpu.pipeline_mode<synchronous>, transform_indices = @transform_6, window_bounds = array<i64: 1, 32>}, {transform_indices = @transform_7, window_bounds = array<i64: 32, 32>}]} {
    %c0_i32 = arith.constant 0 : i32
    %0 = arith.cmpi eq, %arg1, %c0_i32 : i32
    %1 = arith.extui %0 : i1 to i32
    %c0_i32_0 = arith.constant 0 : i32
    %2 = arith.cmpi ne, %1, %c0_i32_0 : i32
    scf.if %2 {
      %cst_18 = arith.constant 0.000000e+00 : f32
      %26 = vector.broadcast %cst_18 : f32 to vector<32x32xf32>
      %c0_19 = arith.constant 0 : index
      %c0_20 = arith.constant 0 : index
      %27 = vector.load %arg10[%c0_19, %c0_20] : memref<32x32xf32, #tpu.memory_space<vmem>>, vector<32x32xf32>
      tpu.vector_store %arg10[%c0_19, %c0_20], %26 {strides = array<i32>} : memref<32x32xf32, #tpu.memory_space<vmem>>, vector<32x32xf32>,
    } else {
    }
    %c0 = arith.constant 0 : index
    %c0_1 = arith.constant 0 : index
    %3 = vector.load %arg2[%c0, %c0_1] : memref<32x32xbf16, #tpu.memory_space<vmem>>, vector<32x32xbf16>
    %c0_2 = arith.constant 0 : index
    %c0_3 = arith.constant 0 : index
    %4 = vector.load %arg3[%c0_2, %c0_3] : memref<32x64xbf16, #tpu.memory_space<vmem>>, vector<32x64xbf16>
    %cst = arith.constant dense<0.000000e+00> : vector<32x64xf32>
    %5 = tpu.matmul %3, %4, %cst {dimension_numbers = #tpu.dot_dimension_numbers<[1], [0], [0], [1], [0, 0, 1, 1], [], []>} : vector<32x32xbf16>, vector<32x64xbf16>, vector<32x64xf32> -> vector<32x64xf32>
    %c0_4 = arith.constant 0 : index
    %c0_5 = arith.constant 0 : index
    %6 = vector.load %arg4[%c0_4, %c0_5] : memref<1x64xf32, #tpu.memory_space<vmem>>, vector<1x64xf32>
    %7 = vector.broadcast %6 : vector<1x64xf32> to vector<32x64xf32>
    %8 = arith.addf %5, %7 : vector<32x64xf32>
    %cst_6 = arith.constant 5.000000e-01 : f32
    %9 = vector.broadcast %cst_6 : f32 to vector<32x64xf32>
    %10 = arith.mulf %9, %8 : vector<32x64xf32>
    %cst_7 = arith.constant 0.707106769 : f32
    %11 = vector.broadcast %cst_7 : f32 to vector<32x64xf32>
    %12 = arith.mulf %8, %11 : vector<32x64xf32>
    %13 = math.erf %12 : vector<32x64xf32>
    %cst_8 = arith.constant 1.000000e+00 : f32
    %14 = vector.broadcast %cst_8 : f32 to vector<32x64xf32>
    %15 = arith.addf %14, %13 : vector<32x64xf32>
    %16 = arith.mulf %10, %15 : vector<32x64xf32>
    %c0_9 = arith.constant 0 : index
    %c0_10 = arith.constant 0 : index
    %17 = vector.load %arg10[%c0_9, %c0_10] : memref<32x32xf32, #tpu.memory_space<vmem>>, vector<32x32xf32>
    %18 = arith.truncf %16 : vector<32x64xf32> to vector<32x64xbf16>
    %c0_11 = arith.constant 0 : index
    %c0_12 = arith.constant 0 : index
    %19 = vector.load %arg5[%c0_11, %c0_12] : memref<64x32xbf16, #tpu.memory_space<vmem>>, vector<64x32xbf16>
    %cst_13 = arith.constant dense<0.000000e+00> : vector<32x32xf32>
    %20 = tpu.matmul %18, %19, %cst_13 {dimension_numbers = #tpu.dot_dimension_numbers<[1], [0], [0], [1], [0, 0, 1, 1], [], []>} : vector<32x64xbf16>, vector<64x32xbf16>, vector<32x32xf32> -> vector<32x32xf32>
    %21 = arith.addf %17, %20 : vector<32x32xf32>
    %c0_14 = arith.constant 0 : index
    %c0_15 = arith.constant 0 : index
    %22 = vector.load %arg10[%c0_14, %c0_15] : memref<32x32xf32, #tpu.memory_space<vmem>>, vector<32x32xf32>
    tpu.vector_store %arg10[%c0_14, %c0_15], %21 {strides = array<i32>} : memref<32x32xf32, #tpu.memory_space<vmem>>, vector<32x32xf32>,
    %c0_i32_16 = arith.constant 0 : i32
    %23 = arith.cmpi eq, %arg1, %c0_i32_16 : i32
    %24 = arith.extui %23 : i1 to i32
    %c0_i32_17 = arith.constant 0 : i32
    %25 = arith.cmpi ne, %24, %c0_i32_17 : i32
    scf.if %25 {
      %c0_18 = arith.constant 0 : index
      %c0_19 = arith.constant 0 : index
      %26 = vector.load %arg10[%c0_18, %c0_19] : memref<32x32xf32, #tpu.memory_space<vmem>>, vector<32x32xf32>
      %c0_20 = arith.constant 0 : index
      %c0_21 = arith.constant 0 : index
      %27 = vector.load %arg6[%c0_20, %c0_21] : memref<1x32xf32, #tpu.memory_space<vmem>>, vector<1x32xf32>
      %28 = vector.broadcast %27 : vector<1x32xf32> to vector<32x32xf32>
      %29 = arith.addf %26, %28 : vector<32x32xf32>
      %30 = arith.extf %3 : vector<32x32xbf16> to vector<32x32xf32>
      %31 = arith.addf %29, %30 : vector<32x32xf32>
      %cst_22 = arith.constant dense<0.000000e+00> : vector<32xf32>
      %32 = vector.multi_reduction <add>, %31, %cst_22 [1] : vector<32x32xf32> to vector<32xf32>
      %33 = vector.shape_cast %32 : vector<32xf32> to vector<32x1xf32>
      %cst_23 = arith.constant 3.200000e+01 : f32
      %34 = vector.broadcast %cst_23 : f32 to vector<32x1xf32>
      %35 = arith.divf %33, %34 : vector<32x1xf32>
      %36 = vector.broadcast %35 : vector<32x1xf32> to vector<32x32xf32>
      %37 = arith.subf %31, %36 : vector<32x32xf32>
      %38 = arith.mulf %37, %37 : vector<32x32xf32>
      %cst_24 = arith.constant dense<0.000000e+00> : vector<32xf32>
      %39 = vector.multi_reduction <add>, %38, %cst_24 [1] : vector<32x32xf32> to vector<32xf32>
      %40 = vector.shape_cast %39 : vector<32xf32> to vector<32x1xf32>
      %cst_25 = arith.constant 3.200000e+01 : f32
      %41 = vector.broadcast %cst_25 : f32 to vector<32x1xf32>
      %42 = arith.divf %40, %41 : vector<32x1xf32>
      %cst_26 = arith.constant 9.99999996E-13 : f32
      %43 = vector.broadcast %cst_26 : f32 to vector<32x1xf32>
      %44 = arith.addf %42, %43 : vector<32x1xf32>
      %45 = math.rsqrt %44 : vector<32x1xf32>
      %46 = vector.broadcast %45 : vector<32x1xf32> to vector<32x32xf32>
      %47 = arith.mulf %37, %46 : vector<32x32xf32>
      %c0_27 = arith.constant 0 : index
      %c0_28 = arith.constant 0 : index
      %48 = vector.load %arg7[%c0_27, %c0_28] : memref<1x32xf32, #tpu.memory_space<vmem>>, vector<1x32xf32>
      %49 = vector.broadcast %48 : vector<1x32xf32> to vector<32x32xf32>
      %50 = arith.mulf %47, %49 : vector<32x32xf32>
      %c0_29 = arith.constant 0 : index
      %c0_30 = arith.constant 0 : index
      %51 = vector.load %arg8[%c0_29, %c0_30] : memref<1x32xf32, #tpu.memory_space<vmem>>, vector<1x32xf32>
      %52 = vector.broadcast %51 : vector<1x32xf32> to vector<32x32xf32>
      %53 = arith.addf %50, %52 : vector<32x32xf32>
      %54 = arith.truncf %53 : vector<32x32xf32> to vector<32x32xbf16>
      %c0_31 = arith.constant 0 : index
      %c0_32 = arith.constant 0 : index
      %55 = vector.load %arg9[%c0_31, %c0_32] : memref<32x32xbf16, #tpu.memory_space<vmem>>, vector<32x32xbf16>
      tpu.vector_store %arg9[%c0_31, %c0_32], %54 {strides = array<i32>} : memref<32x32xbf16, #tpu.memory_space<vmem>>, vector<32x32xbf16>,
    } else {
    }
    return
  }
  func.func @transform_0(%arg0: i32, %arg1: i32) -> (i32, i32) {
    %c0_i32 = arith.constant 0 : i32
    %c0_i32_0 = arith.constant 0 : i32
    return %arg0, %c0_i32 : i32, i32
  }
  func.func @transform_1(%arg0: i32, %arg1: i32) -> (i32, i32) {
    %c0_i32 = arith.constant 0 : i32
    %c0_i32_0 = arith.constant 0 : i32
    return %c0_i32, %arg1 : i32, i32
  }
  func.func @transform_2(%arg0: i32, %arg1: i32) -> (i32, i32) {
    %c0_i32 = arith.constant 0 : i32
    %c0_i32_0 = arith.constant 0 : i32
    return %c0_i32, %arg1 : i32, i32
  }
  func.func @transform_3(%arg0: i32, %arg1: i32) -> (i32, i32) {
    %c0_i32 = arith.constant 0 : i32
    %c0_i32_0 = arith.constant 0 : i32
    return %arg1, %c0_i32 : i32, i32
  }
  func.func @transform_4(%arg0: i32, %arg1: i32) -> (i32, i32) {
    %c0_i32 = arith.constant 0 : i32
    %c0_i32_0 = arith.constant 0 : i32
    %c0_i32_1 = arith.constant 0 : i32
    return %c0_i32, %c0_i32_0 : i32, i32
  }
  func.func @transform_5(%arg0: i32, %arg1: i32) -> (i32, i32) {
    %c0_i32 = arith.constant 0 : i32
    %c0_i32_0 = arith.constant 0 : i32
    %c0_i32_1 = arith.constant 0 : i32
    return %c0_i32, %c0_i32_0 : i32, i32
  }
  func.func @transform_6(%arg0: i32, %arg1: i32) -> (i32, i32) {
    %c0_i32 = arith.constant 0 : i32
    %c0_i32_0 = arith.constant 0 : i32
    %c0_i32_1 = arith.constant 0 : i32
    return %c0_i32, %c0_i32_0 : i32, i32
  }
  func.func @transform_7(%arg0: i32, %arg1: i32) -> (i32, i32) {
    %c0_i32 = arith.constant 0 : i32
    %c0_i32_0 = arith.constant 0 : i32
    return %arg0, %c0_i32 : i32, i32
  }
}

</mosaic_0001>

<bundles_post_ra>
// kernel: mainplm_forward.12
= control target key start
LH: loop header
LB: loop body
LE: loop exit
PB: predicated region body
PF: predicated region fallthrough
CT: control target
= control target key end

     0   :  { %vm58_vm0 = vcmask 261120   ;;  %v267_v27 = vmov 32.0   ;;  %vm211_vm10 = vcmask 257024   ;;  %s371_s1 = inlined_call_operand.vmem [shape: bf16[32,32], index: 1, kind: input, shape index: {}]   ;;  %s372_s2 = inlined_call_operand.vmem [shape: f32[1,32], index: 2, kind: input, shape index: {}]   ;;  %s373_s0 = inlined_call_operand.vmem [shape: bf16[32,32], index: 0, kind: input, shape index: {}]   ;;  %s374_s3 = inlined_call_operand.vmem [shape: bf16[32,32], index: 3, kind: input, shape index: {}]   ;;  %s375_s4 = inlined_call_operand.vmem [shape: f32[1,32], index: 4, kind: input, shape index: {}]   ;;  %s376_s5 = inlined_call_operand.vmem [shape: f32[1,32], index: 5, kind: input, shape index: {}]   ;;  %s377_s6 = inlined_call_operand.vmem [shape: bf16[32,32], index: 6, kind: output, shape index: {}]  }
   0x1   :  { %v241_v0 = vld [vmem:[%s371_s1 + $0x8] sm:$0xff]  ;;  %v240_v1 = vld [vmem:[%s371_s1] sm:$0xff]  ;;  %257 = vrcp.f32 %v267_v27 }
   0x2   :  { %71 = vmatpush.bf16.msra.mxu0 %v241_v0  ;;  %251 = vmatpush.bf16.msra.mxu1 %v241_v0  ;;  %v238_v2 = vld [vmem:[%s373_s0] sm:$0xff]  ;;  %v239_v3 = vld [vmem:[%s373_s0 + $0x8] sm:$0xff] }
   0x3   :  { %v250_v4 = vld [vmem:[%s374_s3 + $0x8] sm:$0xff]   ;;  %v243_v5 = vld [vmem:[%s374_s3] sm:$0xff]  }
   0x4   :  { %v254_v6 = vld [vmem:[%s372_s2] ss:$0 sm:$0xff]  ;;  %v248_v7 = vunpack.c.l.bf16 %v250_v4  ;;  %v244_v8 = vunpack.c.l.bf16 %v243_v5  ;;  %v249_v17 = vunpack.c.h.bf16 %v250_v4  ;;  %v245_v18 = vunpack.c.h.bf16 %v243_v5 }
   0x6   :  { %72 = vmatpush.bf16.msra.mxu0 %v240_v1  ;;  %252 = vmatpush.bf16.msra.mxu1 %v240_v1 }
   0x7   :  { %v258_v28 = vpop.eup %257 }
   0x8   :  { %v109_v29 = vmul.f32 32.0, %v258_v28  ;;  %vm113_vm1 = vweird.f32 %v258_v28 }
   0x9   :  { %236 = vmatmul.msk.bf16.vlgmr.msra.gmra.mxu0 %vm58_vm0, %v238_v2  ;;  %237 = vmatmul.msk.bf16.vlgmr.msra.gmra.mxu1 %vm58_vm0, %v239_v3 }
   0xa   :  { %v110_v30 = vsub.f32 1.0, %v109_v29 }
   0xc   :  { %v111_v31 = vmul.f32 %v258_v28, %v110_v30 }
   0xe   :  { %v112_v32 = vadd.f32 %v258_v28, %v111_v31 }
  0x10   :  { %v114_v33 = vsel %vm113_vm1, %v258_v28, %v112_v32 }
  0x86   :  { %v74_v9 = vpop.f32.mrf.mxu0  ;;  %v79_v10 = vpop.f32.mrf.mxu1 }
  0x87   :  { %v75_v11 = vadd.f32 %v254_v6, %v74_v9  ;;  %v80_v12 = vadd.f32 %v254_v6, %v79_v10 }
  0x89   :  { %v94_v13 = vadd.f32 %v248_v7, %v80_v12  ;;  %v92_v14 = vadd.f32 %v244_v8, %v75_v11 }
  0x8b   :  { %v102_v15 = vsel %vm58_vm0, %v94_v13, 0.0  ;;  %v96_v16 = vsel %vm58_vm0, %v92_v14, 0.0 }
  0x8c   :  { %103 = vadd.xlane.f32.xlu1 %v102_v15  ;;  %97 = vadd.xlane.f32.xlu0 %v96_v16  ;;  %v255_v16 = vld [vmem:[%s375_s4] ss:$0 sm:$0xff] }
  0x8e   :  { %v76_v19 = vpop.f32.mrf.mxu0  ;;  %v81_v20 = vpop.f32.mrf.mxu1 }
  0x8f   :  { %v77_v21 = vadd.f32 %v254_v6, %v76_v19  ;;  %v82_v22 = vadd.f32 %v254_v6, %v81_v20 }
  0x91   :  { %v95_v23 = vadd.f32 %v249_v17, %v82_v22  ;;  %v93_v24 = vadd.f32 %v245_v18, %v77_v21  ;;  %v256_v21 = vld [vmem:[%s376_s5] ss:$0 sm:$0xff] }
  0x93   :  { %v105_v25 = vsel %vm58_vm0, %v95_v23, 0.0  ;;  %v99_v26 = vsel %vm58_vm0, %v93_v24, 0.0 }
  0x94   :  { %106 = vadd.xlane.f32.xlu1 %v105_v25  ;;  %100 = vadd.xlane.f32.xlu0 %v99_v26 }
  0xff   :  { %v104_v34 = vpop.xlane.xlu1 %103  ;;  %v98_v35 = vpop.xlane.xlu0 %97 }
 0x100   :  { %v117_v36 = vmul.f32 %v114_v33, %v104_v34  ;;  %v115_v37 = vmul.f32 %v114_v33, %v98_v35 }
 0x102   :  { %v330_v38 = vsub.f32 %v94_v13, %v117_v36  ;;  %v119_v39 = vsub.f32 %v92_v14, %v115_v37 }
 0x104   :  { %v125_v40 = vmul.f32 %v330_v38, %v330_v38  ;;  %v123_v41 = vmul.f32 %v119_v39, %v119_v39 }
 0x106   :  { %v133_v42 = vsel %vm58_vm0, %v125_v40, 0.0  ;;  %v127_v43 = vsel %vm58_vm0, %v123_v41, 0.0 }
 0x107   :  { %v107_v44 = vpop.xlane.xlu1 %106  ;;  %134 = vadd.xlane.f32.xlu0 %v133_v42  ;;  %128 = vadd.xlane.f32.xlu2 %v127_v43  ;;  %v101_v45 = vpop.xlane.xlu0 %100 }
 0x108   :  { %v118_v46 = vmul.f32 %v114_v33, %v107_v44  ;;  %v116_v47 = vmul.f32 %v114_v33, %v101_v45 }
 0x10a   :  { %v336_v48 = vsub.f32 %v95_v23, %v118_v46  ;;  %v338_v49 = vsub.f32 %v93_v24, %v116_v47 }
 0x10c   :  { %v126_v50 = vmul.f32 %v336_v48, %v336_v48  ;;  %v124_v51 = vmul.f32 %v338_v49, %v338_v49 }
 0x10e   :  { %v136_v52 = vsel %vm58_vm0, %v126_v50, 0.0  ;;  %v130_v53 = vsel %vm58_vm0, %v124_v51, 0.0 }
 0x10f   :  { %137 = vadd.xlane.f32.xlu1 %v136_v52  ;;  %131 = vadd.xlane.f32.xlu2 %v130_v53 }
 0x17a   :  { %v129_v54 = vpop.xlane.xlu2 %128  ;;  %v135_v55 = vpop.xlane.xlu0 %134 }
 0x17b   :  { %v139_v56 = vmul.f32 %v129_v54, %v114_v33  ;;  %v141_v57 = vmul.f32 %v135_v55, %v114_v33 }
 0x17d   :  { %v143_v58 = vadd.f32 1e-12, %v139_v56  ;;  %v145_v59 = vadd.f32 1e-12, %v141_v57 }
 0x17f   :  { %259 = vrsqrt.f32 %v143_v58  ;;  %vm153_vm4 = vweird.f32 %v143_v58  ;;  %vm173_vm6 = vweird.f32 %v145_v59 }
 0x180   :  { %261 = vrsqrt.f32 %v145_v59 }
 0x182   :  { %v138_v60 = vpop.xlane.xlu1 %137  ;;  %v132_v61 = vpop.xlane.xlu2 %131 }
 0x183   :  { %v142_v62 = vmul.f32 %v138_v60, %v114_v33  ;;  %v140_v63 = vmul.f32 %v132_v61, %v114_v33 }
 0x185   :  { %v260_v0 = vpop.eup %259  ;;  %v146_v1 = vadd.f32 1e-12, %v142_v62  ;;  %v144_v2 = vadd.f32 1e-12, %v140_v63 }
 0x186   :  { %v262_v3 = vpop.eup %261  ;;  %v148_v4 = vmul.f32 %v260_v0, %v143_v58  ;;  %vm154_vm2 = vweird.f32 %v260_v0 }
 0x187   :  { %v168_v5 = vmul.f32 %v262_v3, %v145_v59  ;;  %263 = vrsqrt.f32 %v146_v1  ;;  %vm174_vm3 = vweird.f32 %v262_v3  ;;  %vm155_vm5 = vmor %vm153_vm4, %vm154_vm2  ;;  %vm183_vm11 = vweird.f32 %v146_v1 }
 0x188   :  { %v149_v6 = vmul.f32 %v260_v0, %v148_v4  ;;  %265 = vrsqrt.f32 %v144_v2  ;;  %vm175_vm7 = vmor %vm173_vm6, %vm174_vm3  ;;  %vm163_vm13 = vweird.f32 %v144_v2 }
 0x189   :  { %v169_v7 = vmul.f32 %v262_v3, %v168_v5 }
 0x18a   :  { %v150_v8 = vmul.f32 0.5, %v149_v6 }
 0x18b   :  { %v170_v9 = vmul.f32 0.5, %v169_v7 }
 0x18c   :  { %v151_v10 = vsub.f32 1.5, %v150_v8 }
 0x18d   :  { %v264_v11 = vpop.eup %263  ;;  %v171_v12 = vsub.f32 1.5, %v170_v9 }
 0x18e   :  { %v266_v13 = vpop.eup %265  ;;  %v152_v14 = vmul.f32 %v260_v0, %v151_v10  ;;  %v178_v15 = vmul.f32 %v264_v11, %v146_v1  ;;  %vm184_vm8 = vweird.f32 %v264_v11 }
 0x18f   :  { %v172_v17 = vmul.f32 %v262_v3, %v171_v12  ;;  %v158_v18 = vmul.f32 %v266_v13, %v144_v2  ;;  %vm164_vm9 = vweird.f32 %v266_v13  ;;  %vm185_vm12 = vmor %vm183_vm11, %vm184_vm8 }
 0x190   :  { %v156_v19 = vsel %vm155_vm5, %v260_v0, %v152_v14  ;;  %v179_v20 = vmul.f32 %v264_v11, %v178_v15  ;;  %vm165_vm14 = vmor %vm163_vm13, %vm164_vm9 }
 0x191   :  { %v187_v22 = vmul.f32 %v156_v19, %v119_v39  ;;  %v176_v23 = vsel %vm175_vm7, %v262_v3, %v172_v17  ;;  %v159_v24 = vmul.f32 %v266_v13, %v158_v18 }
 0x192   :  { %v189_v25 = vmul.f32 %v176_v23, %v330_v38  ;;  %v180_v26 = vmul.f32 0.5, %v179_v20 }
 0x193   :  { %v195_v27 = vmul.f32 %v255_v16, %v187_v22  ;;  %v160_v28 = vmul.f32 0.5, %v159_v24 }
 0x194   :  { %v197_v29 = vmul.f32 %v255_v16, %v189_v25  ;;  %v181_v30 = vsub.f32 1.5, %v180_v26 }
 0x195   :  { %v203_v31 = vadd.f32 %v256_v21, %v195_v27  ;;  %v161_v32 = vsub.f32 1.5, %v160_v28 }
 0x196   :  { %v205_v33 = vadd.f32 %v256_v21, %v197_v29  ;;  %v182_v34 = vmul.f32 %v264_v11, %v181_v30 }
 0x197   :  { %v207_v35 = vpack.c.bf16 %v203_v31, %v203_v31  ;;  %v162_v36 = vmul.f32 %v266_v13, %v161_v32 }
 0x198   :  { %v209_v37 = vpack.c.bf16 %v205_v33, %v205_v33  ;;  %v186_v39 = vsel %vm185_vm12, %v264_v11, %v182_v34 }
 0x199   :  { %212 = vst.msk [vmem:[%s377_s6] sm:$0xf] %vm211_vm10, %v207_v35  ;;  %v190_v38 = vmul.f32 %v186_v39, %v336_v48  ;;  %v166_v40 = vsel %vm165_vm14, %v266_v13, %v162_v36 }
 0x19a   :  { %214 = vst.msk [vmem:[%s377_s6 + $0x8] sm:$0xf] %vm211_vm10, %v209_v37  ;;  %v188_v41 = vmul.f32 %v166_v40, %v338_v49 }
 0x19b   :  { %v198_v42 = vmul.f32 %v255_v16, %v190_v38 }
 0x19c   :  { %v196_v43 = vmul.f32 %v255_v16, %v188_v41 }
 0x19d   :  { %v206_v44 = vadd.f32 %v256_v21, %v198_v42 }
 0x19e   :  { %v204_v45 = vadd.f32 %v256_v21, %v196_v43 }
 0x19f   :  { %v210_v46 = vpack.c.bf16 %v206_v44, %v206_v44 }
 0x1a0   :  { %v208_v47 = vpack.c.bf16 %v204_v45, %v204_v45 }
 0x1a1   :  { %215 = vst.msk [vmem:[%s377_s6 + $0xc] sm:$0xf] %vm211_vm10, %v210_v46 }
 0x1a2   :  { %213 = vst.msk [vmem:[%s377_s6 + $0x4] sm:$0xf] %vm211_vm10, %v208_v47 }

// kernel: mainplm_forward.9
= control target key start
LH: loop header
LB: loop body
LE: loop exit
PB: predicated region body
PF: predicated region fallthrough
CT: control target
= control target key end

     0   :  { %vm18_vm0 = vcmask 261120   ;;  %v156_v8 = vmov 32.0   ;;  %vm134_vm10 = vcmask 257024   ;;  %s234_s0 = inlined_call_operand.vmem [shape: f32[32,32], index: 0, kind: input, shape index: {}]   ;;  %s235_s1 = inlined_call_operand.vmem [shape: f32[1,32], index: 1, kind: input, shape index: {}]   ;;  %s236_s2 = inlined_call_operand.vmem [shape: f32[1,32], index: 2, kind: input, shape index: {}]   ;;  %s237_s3 = inlined_call_operand.vmem [shape: bf16[32,32], index: 3, kind: output, shape index: {}]  }
   0x1   :  { %v16_v0 = vld [vmem:[%s234_s0 + $0x10] sm:$0xff]  ;;  %v14_v1 = vld [vmem:[%s234_s0] sm:$0xff]  ;;  %v17_v4 = vld [vmem:[%s234_s0 + $0x18] sm:$0xff]  ;;  %146 = vrcp.f32 %v156_v8 }
   0x2   :  { %v25_v2 = vsel %vm18_vm0, %v16_v0, 0.0  ;;  %v19_v3 = vsel %vm18_vm0, %v14_v1, 0.0  ;;  %v15_v5 = vld [vmem:[%s234_s0 + $0x8] sm:$0xff]  ;;  %v28_v6 = vsel %vm18_vm0, %v17_v4, 0.0  ;;  %v144_v61 = vld [vmem:[%s235_s1] ss:$0 sm:$0xff] }
   0x3   :  { %26 = vadd.xlane.f32.xlu1 %v25_v2  ;;  %20 = vadd.xlane.f32.xlu0 %v19_v3  ;;  %v22_v7 = vsel %vm18_vm0, %v15_v5, 0.0  ;;  %v145_v2 = vld [vmem:[%s236_s2] ss:$0 sm:$0xff] }
   0x7   :  { %v147_v9 = vpop.eup %146 }
   0x8   :  { %v32_v10 = vmul.f32 32.0, %v147_v9  ;;  %vm36_vm1 = vweird.f32 %v147_v9 }
   0xa   :  { %v33_v11 = vsub.f32 1.0, %v32_v10 }
   0xb   :  { %29 = vadd.xlane.f32.xlu1 %v28_v6  ;;  %23 = vadd.xlane.f32.xlu0 %v22_v7 }
   0xc   :  { %v34_v12 = vmul.f32 %v147_v9, %v33_v11 }
   0xe   :  { %v35_v13 = vadd.f32 %v147_v9, %v34_v12 }
  0x10   :  { %v37_v14 = vsel %vm36_vm1, %v147_v9, %v35_v13 }
  0x76   :  { %v27_v15 = vpop.xlane.xlu1 %26  ;;  %v21_v16 = vpop.xlane.xlu0 %20 }
  0x77   :  { %v40_v17 = vmul.f32 %v37_v14, %v27_v15  ;;  %v38_v18 = vmul.f32 %v37_v14, %v21_v16 }
  0x79   :  { %v193_v19 = vsub.f32 %v16_v0, %v40_v17  ;;  %v42_v20 = vsub.f32 %v14_v1, %v38_v18 }
  0x7b   :  { %v48_v21 = vmul.f32 %v193_v19, %v193_v19  ;;  %v46_v22 = vmul.f32 %v42_v20, %v42_v20 }
  0x7d   :  { %v56_v23 = vsel %vm18_vm0, %v48_v21, 0.0  ;;  %v50_v24 = vsel %vm18_vm0, %v46_v22, 0.0 }
  0x7e   :  { %v30_v25 = vpop.xlane.xlu1 %29  ;;  %57 = vadd.xlane.f32.xlu0 %v56_v23  ;;  %51 = vadd.xlane.f32.xlu2 %v50_v24  ;;  %v24_v26 = vpop.xlane.xlu0 %23 }
  0x7f   :  { %v41_v27 = vmul.f32 %v37_v14, %v30_v25  ;;  %v39_v28 = vmul.f32 %v37_v14, %v24_v26 }
  0x81   :  { %v199_v29 = vsub.f32 %v17_v4, %v41_v27  ;;  %v201_v30 = vsub.f32 %v15_v5, %v39_v28 }
  0x83   :  { %v49_v31 = vmul.f32 %v199_v29, %v199_v29  ;;  %v47_v32 = vmul.f32 %v201_v30, %v201_v30 }
  0x85   :  { %v59_v33 = vsel %vm18_vm0, %v49_v31, 0.0  ;;  %v53_v34 = vsel %vm18_vm0, %v47_v32, 0.0 }
  0x86   :  { %60 = vadd.xlane.f32.xlu1 %v59_v33  ;;  %54 = vadd.xlane.f32.xlu2 %v53_v34 }
  0xf1   :  { %v52_v35 = vpop.xlane.xlu2 %51  ;;  %v58_v36 = vpop.xlane.xlu0 %57 }
  0xf2   :  { %v62_v37 = vmul.f32 %v52_v35, %v37_v14  ;;  %v64_v38 = vmul.f32 %v58_v36, %v37_v14 }
  0xf4   :  { %v66_v39 = vadd.f32 1e-12, %v62_v37  ;;  %v68_v40 = vadd.f32 1e-12, %v64_v38 }
  0xf6   :  { %148 = vrsqrt.f32 %v66_v39  ;;  %vm76_vm4 = vweird.f32 %v66_v39  ;;  %vm96_vm6 = vweird.f32 %v68_v40 }
  0xf7   :  { %150 = vrsqrt.f32 %v68_v40 }
  0xf9   :  { %v61_v41 = vpop.xlane.xlu1 %60  ;;  %v55_v42 = vpop.xlane.xlu2 %54 }
  0xfa   :  { %v65_v43 = vmul.f32 %v61_v41, %v37_v14  ;;  %v63_v44 = vmul.f32 %v55_v42, %v37_v14 }
  0xfc   :  { %v149_v45 = vpop.eup %148  ;;  %v69_v46 = vadd.f32 1e-12, %v65_v43  ;;  %v67_v47 = vadd.f32 1e-12, %v63_v44 }
  0xfd   :  { %v151_v48 = vpop.eup %150  ;;  %v71_v49 = vmul.f32 %v149_v45, %v66_v39  ;;  %vm77_vm2 = vweird.f32 %v149_v45 }
  0xfe   :  { %v91_v50 = vmul.f32 %v151_v48, %v68_v40  ;;  %152 = vrsqrt.f32 %v69_v46  ;;  %vm97_vm3 = vweird.f32 %v151_v48  ;;  %vm78_vm5 = vmor %vm76_vm4, %vm77_vm2  ;;  %vm106_vm11 = vweird.f32 %v69_v46 }
  0xff   :  { %v72_v51 = vmul.f32 %v149_v45, %v71_v49  ;;  %154 = vrsqrt.f32 %v67_v47  ;;  %vm98_vm7 = vmor %vm96_vm6, %vm97_vm3  ;;  %vm86_vm13 = vweird.f32 %v67_v47 }
 0x100   :  { %v92_v52 = vmul.f32 %v151_v48, %v91_v50 }
 0x101   :  { %v73_v53 = vmul.f32 0.5, %v72_v51 }
 0x102   :  { %v93_v54 = vmul.f32 0.5, %v92_v52 }
 0x103   :  { %v74_v55 = vsub.f32 1.5, %v73_v53 }
 0x104   :  { %v153_v56 = vpop.eup %152  ;;  %v94_v57 = vsub.f32 1.5, %v93_v54 }
 0x105   :  { %v155_v58 = vpop.eup %154  ;;  %v75_v59 = vmul.f32 %v149_v45, %v74_v55  ;;  %v101_v60 = vmul.f32 %v153_v56, %v69_v46  ;;  %vm107_vm8 = vweird.f32 %v153_v56 }
 0x106   :  { %v95_v62 = vmul.f32 %v151_v48, %v94_v57  ;;  %v81_v63 = vmul.f32 %v155_v58, %v67_v47  ;;  %vm87_vm9 = vweird.f32 %v155_v58  ;;  %vm108_vm12 = vmor %vm106_vm11, %vm107_vm8 }
 0x107   :  { %v79_v0 = vsel %vm78_vm5, %v149_v45, %v75_v59  ;;  %v102_v1 = vmul.f32 %v153_v56, %v101_v60  ;;  %vm88_vm14 = vmor %vm86_vm13, %vm87_vm9 }
 0x108   :  { %v110_v3 = vmul.f32 %v79_v0, %v42_v20  ;;  %v99_v4 = vsel %vm98_vm7, %v151_v48, %v95_v62  ;;  %v82_v5 = vmul.f32 %v155_v58, %v81_v63 }
 0x109   :  { %v112_v6 = vmul.f32 %v99_v4, %v193_v19  ;;  %v103_v7 = vmul.f32 0.5, %v102_v1 }
 0x10a   :  { %v118_v8 = vmul.f32 %v144_v61, %v110_v3  ;;  %v83_v9 = vmul.f32 0.5, %v82_v5 }
 0x10b   :  { %v120_v10 = vmul.f32 %v144_v61, %v112_v6  ;;  %v104_v11 = vsub.f32 1.5, %v103_v7 }
 0x10c   :  { %v126_v12 = vadd.f32 %v145_v2, %v118_v8  ;;  %v84_v13 = vsub.f32 1.5, %v83_v9 }
 0x10d   :  { %v128_v14 = vadd.f32 %v145_v2, %v120_v10  ;;  %v105_v15 = vmul.f32 %v153_v56, %v104_v11 }
 0x10e   :  { %v130_v16 = vpack.c.bf16 %v126_v12, %v126_v12  ;;  %v85_v17 = vmul.f32 %v155_v58, %v84_v13 }
 0x10f   :  { %v132_v18 = vpack.c.bf16 %v128_v14, %v128_v14  ;;  %v109_v20 = vsel %vm108_vm12, %v153_v56, %v105_v15 }
 0x110   :  { %135 = vst.msk [vmem:[%s237_s3] sm:$0xf] %vm134_vm10, %v130_v16  ;;  %v113_v19 = vmul.f32 %v109_v20, %v199_v29  ;;  %v89_v21 = vsel %vm88_vm14, %v155_v58, %v85_v17 }
 0x111   :  { %137 = vst.msk [vmem:[%s237_s3 + $0x8] sm:$0xf] %vm134_vm10, %v132_v18  ;;  %v111_v22 = vmul.f32 %v89_v21, %v201_v30 }
 0x112   :  { %v121_v23 = vmul.f32 %v144_v61, %v113_v19 }
 0x113   :  { %v119_v24 = vmul.f32 %v144_v61, %v111_v22 }
 0x114   :  { %v129_v25 = vadd.f32 %v145_v2, %v121_v23 }
 0x115   :  { %v127_v26 = vadd.f32 %v145_v2, %v119_v24 }
 0x116   :  { %v133_v27 = vpack.c.bf16 %v129_v25, %v129_v25 }
 0x117   :  { %v131_v28 = vpack.c.bf16 %v127_v26, %v127_v26 }
 0x118   :  { %138 = vst.msk [vmem:[%s237_s3 + $0xc] sm:$0xf] %vm134_vm10, %v133_v27 }
 0x119   :  { %136 = vst.msk [vmem:[%s237_s3 + $0x4] sm:$0xf] %vm134_vm10, %v131_v28 }

// kernel: mainplm_forward.11
= control target key start
LH: loop header
LB: loop body
LE: loop exit
PB: predicated region body
PF: predicated region fallthrough
CT: control target
= control target key end

     0   :  { %s672_s15 = smov 0   ;;  %s674_s16 = smov 0   ;;  %s741_s0 = inlined_call_operand.vmem [shape: bf16[4,2,8,16], index: 0, kind: input, shape index: {}]   ;;  %s742_s1 = inlined_call_operand.vmem [shape: bf16[4,2,8,16], index: 1, kind: input, shape index: {}]   ;;  %s743_s2 = inlined_call_operand.vmem [shape: bf16[4,2,8,16], index: 2, kind: input, shape index: {}]   ;;  %s744_s3 = inlined_call_operand.vmem [shape: f32[4,1,8], index: 3, kind: input, shape index: {}]   ;;  %s745_s4 = inlined_call_operand.vmem [shape: bf16[4,2,8,16], index: 4, kind: output, shape index: {}]  }
   0x1   :  { %s676_s17 = smov 0   ;;  %s678_s18 = smov 0  }
   0x2   :  { %s680_s19 = smov 0  }
   0x3 LB: > { %s29_s20 = sadd.s32 1, %s637_s17  ;;  %s33_s21 = sadd.s32 1, %s641_s18  ;;  %s645_s19 = sphi %s680_s19, %s14_s19   ;;  %s641_s18 = sphi %s678_s18, %s749_s18   ;;  %s637_s17 = sphi %s676_s17, %s748_s17   ;;  %s633_s16 = sphi %s674_s16, %s747_s16   ;;  %s629_s15 = sphi %s672_s15, %s746_s15  }
   0x4   : > { %p31_p0 = scmp.ge.s32.totalorder %s29_s20, 2  ;;  %p549_p1 = scmp.ge.s32.totalorder %s645_s19, 1 }
   0x5   : > { %p233_p2 = scmp.lt.s32.totalorder %s645_s19, 9 }
   0x6   : > { %s751_s20 = smov (%p31_p0, %s29_s20), 0  ;;  %s753_s21 = smov (!%p31_p0, %s33_s21), %s641_s18 }
   0x7   : > { %p234_p3 = pnand %p549_p1, %p233_p2  ;;  %p35_p4 = scmp.ge.s32.totalorder %s753_s21, 4 }
   0x8   : > { %p290_p5 = scmp.lt.s32.totalorder (!%p234_p3), %s633_s16, 3  ;;  %p292_p6 = scmp.lt.s32.totalorder (!%p234_p3), %s629_s15, 1 }
   0x9   : > { %s755_s21 = smov (%p35_p4, %s753_s21), 0  ;;  %237 = sbr.rel (%p234_p3) target bundleno = 420 (0x1a4), region = 36 }
   0xe   : > { %s757_s16 = smov (!%p290_p5, %s633_s16), 3  ;;  %s759_s15 = smov (!%p292_p6, %s629_s15), 1  ;;  %vm342_vm0 = vcmask 130048   ;;  %vm362_vm1 = vcmask 64512   ;;  %vm376_vm2 = vcmask 1043456   ;;  %vm396_vm3 = vcmask 125952  }
   0xf   : > { %s550_s22 = sshll.u32 %s757_s16, 1  ;;  %s319_s25 = scalar_lea.vmem %s744_s3, %s757_s16 }
  0x10   : > { %s298_s26 = sadd.s32 %s550_s22, %s759_s15  ;;  %v602_v6 = vld [vmem:[%s319_s25] ss:$0 sm:$0xff] }
  0x11   : > { %s705_s27 = sshll.u32 %s298_s26, 2 }
  0x12   : > { %s308_s30 = scalar_lea.vmem %s742_s1, %s705_s27  ;;  %s300_s7 = scalar_lea.vmem %s741_s0, %s705_s27 }
  0x13   : > { %v336_v0 = vld [vmem:[%s308_s30] sm:$0xf]  ;;  %s316_s10 = scalar_lea.vmem %s743_s2, %s705_s27  ;;  %s330_s13 = scalar_lea.vmem %s745_s4, %s705_s27 }
  0x14   : > { %v332_v1 = vld [vmem:[%s300_s7] sm:$0xf]  ;;  %v347_v2 = vsel %vm342_vm0, %v336_v0, 0 }
  0x15   : > { %v333_v3 = vunpack.c.l.bf16 %v332_v1  ;;  %356 = vmatpush.bf16.xpose.msra.mxu0 %v347_v2  ;;  %v337_v11 = vld [vmem:[%s316_s10] sm:$0xf] }
  0x16   : > { %v378_v12 = vsel %vm376_vm2, %v337_v11, 0 }
  0x17   : > { %v334_v4 = vmul.f32 0.25, %v333_v3  ;;  %387 = vmatpush.bf16.msra.mxu1 %v378_v12 }
  0x19   : > { %v335_v5 = vpack.c.bf16 %v334_v4, %v334_v4 }
  0x1c   : > { %558 = vmatmul.msk.bf16.vlgmr.msra.gmra.mxu0 %vm342_vm0, %v335_v5 }
  0x99   : > { %v358_v7 = vpop.f32.mrf.mxu0 }
  0x9a   : > { %v359_v8 = vadd.f32 %v602_v6, %v358_v7 }
  0x9c   : > { %v363_v9 = vsel %vm362_vm1, %v359_v8, -inf }
  0x9d   : > { %364 = vmax.xlane.f32.xlu0 %v363_v9 }
  0xa1   : > { %v360_v10 = vpop.f32.mrf.mxu0 }
 0x110   : > { %v365_v13 = vpop.xlane.xlu0 %364 }
 0x111   : > { %v366_v14 = vsub.f32 %v359_v8, %v365_v13 }
 0x113   : > { %v367_v15 = vmul.f32 1.442695, %v366_v14 }
 0x115   : > { %603 = vpow2.f32 %v367_v15 }
 0x11b   : > { %v604_v16 = vpop.eup %603 }
 0x11c   : > { %v369_v17 = vsel %vm362_vm1, %v604_v16, 0.0  ;;  %v372_v18 = vpack.c.bf16 %v604_v16, %v604_v16 }
 0x11d   : > { %370 = vadd.xlane.f32.xlu0 %v369_v17 }
 0x11e   : > { %559 = vmatmul.msk.bf16.vlgmr.msra.gmra.mxu1 %vm362_vm1, %v372_v18 }
 0x190   : > { %v371_v19 = vpop.xlane.xlu0 %370 }
 0x191   : > { %605 = vrcp.f32 %v371_v19 }
 0x197   : > { %v606_v20 = vpop.eup %605 }
 0x19b   : > { %v389_v21 = vpop.f32.mrf.mxu1 }
 0x19c   : > { %v394_v22 = vmul.f32 %v606_v20, %v389_v21 }
 0x19e   : > { %v395_v23 = vpack.c.bf16 %v394_v22, %v394_v22 }
 0x1a0   : > { %397 = vst.msk [vmem:[%s330_s13] sm:$0xf] %vm396_vm3, %v395_v23 }
 0x1a3   : > { %v391_v24 = vpop.f32.mrf.mxu1 }
 0x1a4 PF: > { %s14_s19 = sadd.s32 1, %s645_s19   ;;  %s746_s15 = smov %s637_s17 }
 0x1a5   : > { %p11_p7 = scmp.ge.s32.totalorder %s14_s19, 10   ;;  %s747_s16 = smov %s641_s18 }
 0x1a6   : > { %s748_s17 = smov %s751_s20  ;;  %s749_s18 = smov %s755_s21 }
 0x1a7   :  { %13 = sbr.rel (!%p11_p7) target bundleno = 3 (0x3), region = 75 }

// kernel: mainplm_forward.10
= control target key start
LH: loop header
LB: loop body
LE: loop exit
PB: predicated region body
PF: predicated region fallthrough
CT: control target
= control target key end

     0   :  { %vm49_vm0 = vcmask 261120   ;;  %vm79_vm1 = vcmask 781312   ;;  %s160_s1 = inlined_call_operand.vmem [shape: bf16[32,96], index: 1, kind: input, shape index: {}]   ;;  %s161_s2 = inlined_call_operand.vmem [shape: f32[1,96], index: 2, kind: input, shape index: {}]   ;;  %s162_s0 = inlined_call_operand.vmem [shape: bf16[32,32], index: 0, kind: input, shape index: {}]   ;;  %s163_s3 = inlined_call_operand.vmem [shape: bf16[32,96], index: 3, kind: output, shape index: {}]  }
   0x1   :  { %v109_v0 = vld [vmem:[%s160_s1 + $0x8] sm:$0xff]  ;;  %v108_v1 = vld [vmem:[%s160_s1] sm:$0xff] }
   0x2   :  { %62 = vmatpush.bf16.msra.mxu0 %v109_v0  ;;  %110 = vmatpush.bf16.msra.mxu1 %v109_v0  ;;  %v106_v2 = vld [vmem:[%s162_s0] sm:$0xff]  ;;  %v107_v3 = vld [vmem:[%s162_s0 + $0x8] sm:$0xff] }
   0x3   :  { %v112_v4 = vld [vmem:[%s161_s2] ss:$0 sm:$0xff] }
   0x6   :  { %63 = vmatpush.bf16.msra.mxu0 %v108_v1  ;;  %111 = vmatpush.bf16.msra.mxu1 %v108_v1 }
   0x9   :  { %104 = vmatmul.msk.bf16.vlgmr.msra.gmra.mxu0 %vm49_vm0, %v106_v2  ;;  %105 = vmatmul.msk.bf16.vlgmr.msra.gmra.mxu1 %vm49_vm0, %v107_v3 }
  0x86   :  { %v65_v5 = vpop.f32.mrf.mxu0  ;;  %v70_v6 = vpop.f32.mrf.mxu1 }
  0x87   :  { %v66_v7 = vadd.f32 %v112_v4, %v65_v5  ;;  %v71_v8 = vadd.f32 %v112_v4, %v70_v6 }
  0x89   :  { %v75_v9 = vpack.c.bf16 %v66_v7, %v66_v7  ;;  %v77_v10 = vpack.c.bf16 %v71_v8, %v71_v8 }
  0x8b   :  { %80 = vst.msk [vmem:[%s163_s3] sm:$0xf] %vm79_vm1, %v75_v9 }
  0x8c   :  { %82 = vst.msk [vmem:[%s163_s3 + $0x8] sm:$0xf] %vm79_vm1, %v77_v10 }
  0x8e   :  { %v67_v11 = vpop.f32.mrf.mxu0  ;;  %v72_v12 = vpop.f32.mrf.mxu1 }
  0x8f   :  { %v68_v13 = vadd.f32 %v112_v4, %v67_v11  ;;  %v73_v14 = vadd.f32 %v112_v4, %v72_v12 }
  0x91   :  { %v76_v15 = vpack.c.bf16 %v68_v13, %v68_v13  ;;  %v78_v16 = vpack.c.bf16 %v73_v14, %v73_v14 }
  0x93   :  { %81 = vst.msk [vmem:[%s163_s3 + $0x4] sm:$0xf] %vm79_vm1, %v76_v15 }
  0x94   :  { %83 = vst.msk [vmem:[%s163_s3 + $0xc] sm:$0xf] %vm79_vm1, %v78_v16 }

// kernel: mainplm_forward.13
= control target key start
LH: loop header
LB: loop body
LE: loop exit
PB: predicated region body
PF: predicated region fallthrough
CT: control target
= control target key end

     0   :  { %vm31_vm0 = vcmask 261120   ;;  %s835_s1 = inlined_call_operand.vmem [shape: bf16[32,64], index: 1, kind: input, shape index: {}]   ;;  %s836_s2 = inlined_call_operand.vmem [shape: f32[1,64], index: 2, kind: input, shape index: {}]   ;;  %s837_s0 = inlined_call_operand.vmem [shape: bf16[32,32], index: 0, kind: input, shape index: {}]   ;;  %s838_s3 = inlined_call_operand.vmem [shape: bf16[64,32], index: 3, kind: input, shape index: {}]   ;;  %s839_s4 = inlined_call_operand.vmem [shape: f32[1,32], index: 4, kind: input, shape index: {}]   ;;  %s840_s5 = inlined_call_operand.vmem [shape: f32[1,32], index: 5, kind: input, shape index: {}]   ;;  %s841_s6 = inlined_call_operand.vmem [shape: f32[1,32], index: 6, kind: input, shape index: {}]   ;;  %s842_s7 = inlined_call_operand.vmem [shape: bf16[32,32], index: 7, kind: output, shape index: {}]  }
   0x1   :  { %v534_v0 = vld [vmem:[%s835_s1 + $0x8] sm:$0xff]  ;;  %v533_v1 = vld [vmem:[%s835_s1] sm:$0xff]  ;;  %v538_v51 = vld [vmem:[%s838_s3 + $0x18] sm:$0xff] }
   0x2   :  { %83 = vmatpush.bf16.msra.mxu0 %v534_v0  ;;  %539 = vmatpush.bf16.msra.mxu3 %v534_v0  ;;  %v531_v2 = vld [vmem:[%s837_s0] sm:$0xff]  ;;  %v532_v3 = vld [vmem:[%s837_s0 + $0x8] sm:$0xff]  ;;  %v537_v61 = vld [vmem:[%s838_s3 + $0x10] sm:$0xff] }
   0x3   :  { %v547_v4 = vld [vmem:[%s836_s2] ss:$0 sm:$0xff]  ;;  %321 = vmatpush.bf16.msra.mxu1 %v538_v51  ;;  %541 = vmatpush.bf16.msra.mxu2 %v538_v51 }
   0x6   :  { %84 = vmatpush.bf16.msra.mxu0 %v533_v1  ;;  %540 = vmatpush.bf16.msra.mxu3 %v533_v1 }
   0x7   :  { %322 = vmatpush.bf16.msra.mxu1 %v537_v61  ;;  %542 = vmatpush.bf16.msra.mxu2 %v537_v61 }
   0x9   :  { %507 = vmatmul.msk.bf16.vlgmr.msra.gmra.mxu0 %vm31_vm0, %v531_v2  ;;  %508 = vmatmul.msk.bf16.vlgmr.msra.gmra.mxu3 %vm31_vm0, %v532_v3 }
  0x86   :  { %v86_v5 = vpop.f32.mrf.mxu0 }
  0x87   :  { %v628_v6 = vadd.f32 %v547_v4, %v86_v5 }
  0x89   :  { %v631_v7 = vmul.f32 0.70710677, %v628_v6 }
  0x8b   :  { %v104_v8 = vmul.f32 %v631_v7, %v631_v7 }
  0x8c   :  { %v91_v9 = vpop.f32.mrf.mxu3 }
  0x8d   :  { %v635_v10 = vmin.f32 %v104_v8, 16.0  ;;  %v637_v11 = vadd.f32 %v547_v4, %v91_v9  ;;  %v536_v8 = vld [vmem:[%s838_s3 + $0x8] sm:$0xff] }
  0x8e   :  { %v88_v12 = vpop.f32.mrf.mxu0  ;;  %323 = vmatpush.bf16.msra.mxu1 %v536_v8  ;;  %543 = vmatpush.bf16.msra.mxu2 %v536_v8 }
  0x8f   :  { %v106_v13 = vmul.f32 2.1237322e-06, %v635_v10  ;;  %v117_v14 = vmul.f32 3.8918573e-05, %v635_v10  ;;  %v641_v15 = vadd.f32 %v547_v4, %v88_v12  ;;  %v644_v16 = vmul.f32 0.70710677, %v637_v11 }
  0x91   :  { %v118_v17 = vadd.f32 0.001143296, %v117_v14  ;;  %v107_v18 = vadd.f32 0.00028619796, %v106_v13  ;;  %v184_v19 = vmul.f32 %v644_v16, %v644_v16  ;;  %v649_v20 = vmul.f32 0.70710677, %v641_v15 }
  0x93   :  { %v119_v21 = vmul.f32 %v118_v17, %v635_v10  ;;  %v652_v22 = vmin.f32 %v184_v19, 16.0  ;;  %v144_v23 = vmul.f32 %v649_v20, %v649_v20  ;;  %v108_v27 = vmul.f32 %v107_v18, %v635_v10 }
  0x94   :  { %v93_v24 = vpop.f32.mrf.mxu3 }
  0x95   :  { %v120_v25 = vadd.f32 0.014752088, %v119_v21  ;;  %v656_v26 = vadd.f32 %v547_v4, %v93_v24  ;;  %v197_v28 = vmul.f32 3.8918573e-05, %v652_v22  ;;  %v660_v29 = vmin.f32 %v144_v23, 16.0 }
  0x96   :  { %v186_v32 = vmul.f32 2.1237322e-06, %v652_v22  ;;  %v109_v38 = vadd.f32 0.0036580483, %v108_v27  ;;  %v535_v27 = vld [vmem:[%s838_s3] sm:$0xff] }
  0x97   :  { %v121_v30 = vmul.f32 %v120_v25, %v635_v10  ;;  %v664_v31 = vmul.f32 0.70710677, %v656_v26  ;;  %v198_v33 = vadd.f32 0.001143296, %v197_v28  ;;  %v146_v34 = vmul.f32 2.1237322e-06, %v660_v29  ;;  %324 = vmatpush.bf16.msra.mxu1 %v535_v27  ;;  %544 = vmatpush.bf16.msra.mxu2 %v535_v27 }
  0x98   :  { %v157_v36 = vmul.f32 3.8918573e-05, %v660_v29  ;;  %v187_v44 = vadd.f32 0.00028619796, %v186_v32  ;;  %v110_v52 = vmul.f32 %v109_v38, %v635_v10 }
  0x99   :  { %v122_v35 = vadd.f32 0.112945676, %v121_v30  ;;  %v224_v37 = vmul.f32 %v664_v31, %v664_v31  ;;  %v199_v39 = vmul.f32 %v198_v33, %v652_v22  ;;  %v147_v41 = vadd.f32 0.00028619796, %v146_v34 }
  0x9a   :  { %v158_v42 = vadd.f32 0.001143296, %v157_v36  ;;  %v188_v56 = vmul.f32 %v187_v44, %v652_v22  ;;  %v111_v0 = vadd.f32 0.05243302, %v110_v52 }
  0x9b   :  { %v123_v40 = vmul.f32 %v122_v35, %v635_v10  ;;  %v673_v43 = vmin.f32 %v224_v37, 16.0  ;;  %v200_v45 = vadd.f32 0.014752088, %v199_v39  ;;  %v148_v54 = vmul.f32 %v147_v41, %v660_v29 }
  0x9c   :  { %v159_v47 = vmul.f32 %v158_v42, %v660_v29  ;;  %v189_v3 = vadd.f32 0.0036580483, %v188_v56  ;;  %v112_v13 = vmul.f32 %v111_v0, %v635_v10 }
  0x9d   :  { %v124_v46 = vadd.f32 0.4994258, %v123_v40  ;;  %v201_v48 = vmul.f32 %v200_v45, %v652_v22  ;;  %v226_v49 = vmul.f32 2.1237322e-06, %v673_v43  ;;  %v237_v50 = vmul.f32 3.8918573e-05, %v673_v43 }
  0x9e   :  { %v160_v55 = vadd.f32 0.014752088, %v159_v47  ;;  %v149_v1 = vadd.f32 0.0036580483, %v148_v54  ;;  %v190_v19 = vmul.f32 %v189_v3, %v652_v22  ;;  %v113_v32 = vadd.f32 0.18741608, %v112_v13 }
  0x9f   :  { %v125_v53 = vmul.f32 %v124_v46, %v635_v10  ;;  %v202_v57 = vadd.f32 0.112945676, %v201_v48  ;;  %v238_v58 = vadd.f32 0.001143296, %v237_v50  ;;  %v227_v63 = vadd.f32 0.00028619796, %v226_v49 }
  0xa0   :  { %v161_v60 = vmul.f32 %v160_v55, %v660_v29  ;;  %v150_v14 = vmul.f32 %v149_v1, %v660_v29  ;;  %v191_v35 = vadd.f32 0.05243302, %v190_v19  ;;  %v114_v42 = vmul.f32 %v113_v32, %v635_v10 }
  0xa1   :  { %v686_v59 = vadd.f32 1.0, %v125_v53  ;;  %v203_v62 = vmul.f32 %v202_v57, %v652_v22  ;;  %v239_v2 = vmul.f32 %v238_v58, %v673_v43  ;;  %v228_v12 = vmul.f32 %v227_v63, %v673_v43 }
  0xa2   :  { %v162_v5 = vadd.f32 0.112945676, %v161_v60  ;;  %v151_v33 = vadd.f32 0.05243302, %v150_v14  ;;  %v192_v47 = vmul.f32 %v191_v35, %v652_v22  ;;  %v115_v52 = vadd.f32 1.1283791, %v114_v42 }
  0xa3   :  { %551 = vrcp.f32 %v686_v59  ;;  %v204_v4 = vadd.f32 0.4994258, %v203_v62  ;;  %v240_v18 = vadd.f32 0.014752088, %v239_v2  ;;  %v229_v30 = vadd.f32 0.0036580483, %v228_v12 }
  0xa4   :  { %v163_v17 = vmul.f32 %v162_v5, %v660_v29  ;;  %v152_v44 = vmul.f32 %v151_v33, %v660_v29  ;;  %v138_v48 = vand.u32 2147483648, %v686_v59  ;;  %vm132_vm2 = vweird.f32 %v686_v59 }
  0xa5   :  { %v205_v9 = vmul.f32 %v204_v4, %v652_v22  ;;  %v241_v25 = vmul.f32 %v240_v18, %v673_v43  ;;  %v230_v40 = vmul.f32 %v229_v30, %v673_v43  ;;  %v136_v50 = vand.u32 2147483647, %v686_v59 }
  0xa6   :  { %v164_v24 = vadd.f32 0.4994258, %v163_v17  ;;  %v153_v55 = vadd.f32 0.18741608, %v152_v44  ;;  %v193_v57 = vadd.f32 0.18741608, %v192_v47  ;;  %v116_v4 = vmul.f32 %v115_v52, %v631_v7 }
  0xa7   :  { %v704_v21 = vadd.f32 1.0, %v205_v9  ;;  %v242_v37 = vadd.f32 0.112945676, %v241_v25  ;;  %v231_v10 = vadd.f32 0.05243302, %v230_v40  ;;  %v139_v60 = vor.u32 1.1754944e-38, %v138_v48 }
  0xa8   :  { %v165_v36 = vmul.f32 %v164_v24, %v660_v29  ;;  %v569_v62 = vmov 0.0   ;;  %vm137_vm4 = vcmp.eq.f32.partialorder %v136_v50, 8.507059e+37  ;;  %v154_v2 = vmul.f32 %v153_v55, %v660_v29 }
  0xa9   :  { %v552_v23 = vpop.eup %551  ;;  %553 = vrcp.f32 %v704_v21  ;;  %v243_v41 = vmul.f32 %v242_v37, %v673_v43  ;;  %32 = vst.msk [vmem:[#allocation2] sm:$0xff] %vm31_vm0, %v569_v62  ;;  %v232_v63 = vmul.f32 %v231_v10, %v673_v43  ;;  %v194_v5 = vmul.f32 %v193_v57, %v652_v22 }
  0xaa   :  { %v128_v28 = vmul.f32 %v552_v23, %v686_v59  ;;  %v713_v39 = vadd.f32 1.0, %v165_v36  ;;  %vm133_vm1 = vweird.f32 %v552_v23  ;;  %33 = vst.msk [vmem:[#allocation2 + $0x8] sm:$0xff] %vm31_vm0, %v569_v62  ;;  %vm212_vm5 = vweird.f32 %v704_v21 }
  0xab   :  { %v244_v51 = vadd.f32 0.4994258, %v243_v41  ;;  %vm728_vm3 = vmor %vm132_vm2, %vm133_vm1  ;;  %34 = vst.msk [vmem:[#allocation2 + $0x10] sm:$0xff] %vm31_vm0, %v569_v62  ;;  %v216_v29 = vand.u32 2147483647, %v704_v21  ;;  %v218_v13 = vand.u32 2147483648, %v704_v21 }
  0xac   :  { %v129_v34 = vsub.f32 1.0, %v128_v28  ;;  %555 = vrcp.f32 %v713_v39  ;;  %35 = vst.msk [vmem:[#allocation2 + $0x18] sm:$0xff] %vm31_vm0, %v569_v62  ;;  %v178_v7 = vand.u32 2147483648, %v713_v39  ;;  %v233_v14 = vadd.f32 0.18741608, %v232_v63 }
  0xad   :  { %v245_v58 = vmul.f32 %v244_v51, %v673_v43  ;;  %v155_v22 = vadd.f32 1.1283791, %v154_v2  ;;  %v176_v18 = vand.u32 2147483647, %v713_v39  ;;  %v195_v19 = vadd.f32 1.1283791, %v194_v5 }
  0xae   :  { %v130_v38 = vmul.f32 %v552_v23, %v129_v34  ;;  %vm217_vm9 = vcmp.eq.f32.partialorder %v216_v29, 8.507059e+37  ;;  %vm172_vm10 = vweird.f32 %v713_v39  ;;  %v219_v30 = vor.u32 1.1754944e-38, %v218_v13 }
  0xaf   :  { %v719_v45 = vpop.eup %553  ;;  %v738_v0 = vadd.f32 1.0, %v245_v58  ;;  %v179_v32 = vor.u32 1.1754944e-38, %v178_v7  ;;  %v234_v33 = vmul.f32 %v233_v14, %v673_v43  ;;  %vm177_vm12 = vcmp.eq.f32.partialorder %v176_v18, 8.507059e+37 }
  0xb0   :  { %v131_v46 = vadd.f32 %v552_v23, %v130_v38  ;;  %v208_v49 = vmul.f32 %v719_v45, %v704_v21  ;;  %vm213_vm6 = vweird.f32 %v719_v45  ;;  %v156_v21 = vmul.f32 %v155_v22, %v649_v20  ;;  %v272_v63 = vld [vmem:[#allocation2] sm:$0xff] }
  0xb1   :  { %557 = vrcp.f32 %v738_v0  ;;  %vm757_vm8 = vmor %vm212_vm5, %vm213_vm6  ;;  %v196_v38 = vmul.f32 %v195_v19, %v644_v16  ;;  %v235_v42 = vadd.f32 1.1283791, %v234_v33  ;;  %v256_v44 = vand.u32 2147483647, %v738_v0  ;;  %v273_v2 = vld [vmem:[#allocation2 + $0x8] sm:$0xff] }
  0xb2   :  { %v209_v54 = vsub.f32 1.0, %v208_v49  ;;  %v135_v56 = vsel %vm728_vm3, %v552_v23, %v131_v46  ;;  %v556_v59 = vpop.eup %555  ;;  %v96_v20 = vmul.f32 0.5, %v628_v6  ;;  %v97_v48 = vmul.f32 0.5, %v641_v15  ;;  %v38_v23 = vld [vmem:[%s837_s0 + $0x8] sm:$0xff]  }
  0xb3   :  { %v140_v1 = vsel %vm137_vm4, %v139_v60, %v135_v56  ;;  %v168_v3 = vmul.f32 %v556_v59, %v713_v39  ;;  %vm173_vm7 = vweird.f32 %v556_v59  ;;  %vm252_vm14 = vweird.f32 %v738_v0  ;;  %v275_v19 = vld [vmem:[#allocation2 + $0x18] sm:$0xff] }
  0xb4   :  { %v210_v61 = vmul.f32 %v719_v45, %v209_v54  ;;  %v141_v12 = vmul.f32 %v140_v1, %v116_v4  ;;  %vm174_vm11 = vmor %vm172_vm10, %vm173_vm7  ;;  %v236_v10 = vmul.f32 %v235_v42, %v664_v31  ;;  %vm257_vm1 = vcmp.eq.f32.partialorder %v256_v44, 8.507059e+37 }
  0xb5   :  { %v169_v9 = vsub.f32 1.0, %v168_v3  ;;  %vm310_vm2 = vcmask 523264   ;;  %v98_v15 = vmul.f32 0.5, %v637_v11  ;;  %v99_v60 = vmul.f32 0.5, %v656_v26  ;;  %v36_v3 = vld [vmem:[%s837_s0] sm:$0xff]  }
  0xb6   :  { %v211_v8 = vadd.f32 %v719_v45, %v210_v61  ;;  %v509_v28 = vclamps-f32 %v141_v12, 1.0  ;;  %v548_v11 = vld [vmem:[%s839_s4] ss:$0 sm:$0xff]  ;;  %v359_v5 = vunpack.c.l.bf16 %v36_v3  ;;  %v360_v22 = vunpack.c.h.bf16 %v36_v3 }
  0xb7   :  { %v170_v17 = vmul.f32 %v556_v59, %v169_v9  ;;  %v558_v27 = vpop.eup %557  ;;  %v274_v9 = vld [vmem:[#allocation2 + $0x10] sm:$0xff]  ;;  %vm482_vm7 = vcmask 257024  }
  0xb8   :  { %v215_v24 = vsel %vm757_vm8, %v719_v45, %v211_v8  ;;  %v248_v35 = vmul.f32 %v558_v27, %v738_v0  ;;  %v264_v39 = vadd.f32 1.0, %v509_v28  ;;  %v258_v45 = vand.u32 2147483648, %v738_v0 }
  0xb9   :  { %v171_v25 = vadd.f32 %v556_v59, %v170_v17  ;;  %v220_v36 = vsel %vm217_vm9, %v219_v30, %v215_v24  ;;  %vm253_vm13 = vweird.f32 %v558_v27  ;;  %v361_v30 = vunpack.c.l.bf16 %v38_v23 }
  0xba   :  { %v249_v41 = vsub.f32 1.0, %v248_v35  ;;  %v221_v46 = vmul.f32 %v220_v36, %v196_v38  ;;  %v268_v16 = vmul.f32 %v264_v39, %v96_v20  ;;  %vm254_vm15 = vmor %vm252_vm14, %vm253_vm13  ;;  %v259_v51 = vor.u32 1.1754944e-38, %v258_v45 }
  0xbb   :  { %v175_v34 = vsel %vm174_vm11, %v556_v59, %v171_v25  ;;  %v362_v35 = vunpack.c.h.bf16 %v38_v23 }
  0xbc   :  { %v180_v37 = vsel %vm177_vm12, %v179_v32, %v175_v34  ;;  %v250_v47 = vmul.f32 %v558_v27, %v249_v41  ;;  %v511_v52 = vclamps-f32 %v221_v46, 1.0  ;;  %v570_v41 = vmov 32.0  }
  0xbd   :  { %v181_v40 = vmul.f32 %v180_v37, %v156_v21  ;;  %559 = vrcp.f32 %v570_v41 }
  0xbe   :  { %v251_v50 = vadd.f32 %v558_v27, %v250_v47  ;;  %v266_v6 = vadd.f32 1.0, %v511_v52 }
  0xbf   :  { %v510_v43 = vclamps-f32 %v181_v40, 1.0 }
  0xc0   :  { %v255_v54 = vsel %vm254_vm15, %v558_v27, %v251_v50  ;;  %v270_v62 = vmul.f32 %v266_v6, %v98_v15 }
  0xc1   :  { %v265_v49 = vadd.f32 1.0, %v510_v43  ;;  %v260_v55 = vsel %vm257_vm1, %v259_v51, %v255_v54 }
  0xc2   :  { %v261_v56 = vmul.f32 %v260_v55, %v236_v10 }
  0xc3   :  { %v269_v53 = vmul.f32 %v265_v49, %v97_v48  ;;  %v560_v39 = vpop.eup %559 }
  0xc4   :  { %v512_v58 = vclamps-f32 %v261_v56, 1.0  ;;  %v380_v42 = vmul.f32 32.0, %v560_v39  ;;  %vm384_vm3 = vweird.f32 %v560_v39 }
  0xc5   :  { %v276_v57 = vpack.c.bf16 %v269_v53, %v268_v16 }
  0xc6   :  { %v267_v61 = vadd.f32 1.0, %v512_v58  ;;  %v381_v44 = vsub.f32 1.0, %v380_v42 }
  0xc7   :  { %529 = vmatmul.msk.bf16.vlgmr.msra.gmra.mxu1 %vm310_vm2, %v276_v57 }
  0xc8   :  { %v271_v31 = vmul.f32 %v267_v61, %v99_v60  ;;  %v382_v45 = vmul.f32 %v560_v39, %v381_v44 }
  0xca   :  { %v277_v59 = vpack.c.bf16 %v271_v31, %v270_v62  ;;  %v383_v46 = vadd.f32 %v560_v39, %v382_v45 }
  0xcc   :  { %530 = vmatmul.msk.bf16.vlgmr.msra.gmra.mxu2 %vm310_vm2, %v277_v59  ;;  %v385_v43 = vsel %vm384_vm3, %v560_v39, %v383_v46 }
 0x144   :  { %v326_v0 = vpop.f32.mrf.mxu1 }
 0x145   :  { %v336_v1 = vadd.f32 %v326_v0, %v272_v63 }
 0x147   :  { %340 = vst.msk [vmem:[#allocation2] sm:$0xff] %vm31_vm0, %v336_v1 }
 0x14c   :  { %v328_v26 = vpop.f32.mrf.mxu1 }
 0x14d   :  { %v337_v4 = vadd.f32 %v328_v26, %v273_v2 }
 0x14e   :  { %v347_v8 = vld [vmem:[#allocation2] sm:$0xff] }
 0x14f   :  { %341 = vst.msk [vmem:[#allocation2 + $0x8] sm:$0xff] %vm31_vm0, %v337_v4  ;;  %v355_v29 = vadd.f32 %v548_v11, %v347_v8  ;;  %v331_v13 = vpop.f32.mrf.mxu2 }
 0x150   :  { %v338_v7 = vadd.f32 %v331_v13, %v274_v9 }
 0x151   :  { %v363_v12 = vadd.f32 %v359_v5, %v355_v29 }
 0x152   :  { %342 = vst.msk [vmem:[#allocation2 + $0x10] sm:$0xff] %vm31_vm0, %v338_v7 }
 0x153   :  { %v367_v14 = vsel %vm31_vm0, %v363_v12, 0.0 }
 0x154   :  { %368 = vadd.xlane.f32.xlu0 %v367_v14  ;;  %v549_v14 = vld [vmem:[%s840_s5] ss:$0 sm:$0xff] }
 0x156   :  { %v348_v17 = vld [vmem:[#allocation2 + $0x8] sm:$0xff] }
 0x157   :  { %v356_v18 = vadd.f32 %v548_v11, %v348_v17  ;;  %v333_v25 = vpop.f32.mrf.mxu2 }
 0x158   :  { %v339_v27 = vadd.f32 %v333_v25, %v275_v19  ;;  %v550_v19 = vld [vmem:[%s841_s6] ss:$0 sm:$0xff] }
 0x159   :  { %v364_v24 = vadd.f32 %v360_v22, %v356_v18  ;;  %v349_v32 = vld [vmem:[#allocation2 + $0x10] sm:$0xff] }
 0x15a   :  { %343 = vst.msk [vmem:[#allocation2 + $0x18] sm:$0xff] %vm31_vm0, %v339_v27  ;;  %v357_v33 = vadd.f32 %v548_v11, %v349_v32 }
 0x15b   :  { %v370_v28 = vsel %vm31_vm0, %v364_v24, 0.0 }
 0x15c   :  { %371 = vadd.xlane.f32.xlu0 %v370_v28  ;;  %v365_v21 = vadd.f32 %v361_v30, %v357_v33 }
 0x15e   :  { %v373_v34 = vsel %vm31_vm0, %v365_v21, 0.0 }
 0x15f   :  { %374 = vadd.xlane.f32.xlu1 %v373_v34 }
 0x161   :  { %v350_v36 = vld [vmem:[#allocation2 + $0x18] sm:$0xff] }
 0x162   :  { %v358_v37 = vadd.f32 %v548_v11, %v350_v36 }
 0x164   :  { %v366_v38 = vadd.f32 %v362_v35, %v358_v37 }
 0x166   :  { %v376_v40 = vsel %vm31_vm0, %v366_v38, 0.0 }
 0x167   :  { %377 = vadd.xlane.f32.xlu1 %v376_v40 }
 0x1c7   :  { %v369_v47 = vpop.xlane.xlu0 %368 }
 0x1c8   :  { %v386_v20 = vmul.f32 %v385_v43, %v369_v47 }
 0x1ca   :  { %v390_v48 = vsub.f32 %v363_v12, %v386_v20 }
 0x1cc   :  { %v394_v49 = vmul.f32 %v390_v48, %v390_v48 }
 0x1ce   :  { %v398_v50 = vsel %vm31_vm0, %v394_v49, 0.0 }
 0x1cf   :  { %399 = vadd.xlane.f32.xlu2 %v398_v50  ;;  %v372_v16 = vpop.xlane.xlu0 %371 }
 0x1d0   :  { %v387_v10 = vmul.f32 %v385_v43, %v372_v16 }
 0x1d2   :  { %v795_v51 = vsub.f32 %v364_v24, %v387_v10  ;;  %v375_v53 = vpop.xlane.xlu1 %374 }
 0x1d3   :  { %v388_v54 = vmul.f32 %v385_v43, %v375_v53 }
 0x1d4   :  { %v395_v52 = vmul.f32 %v795_v51, %v795_v51 }
 0x1d5   :  { %v800_v56 = vsub.f32 %v365_v21, %v388_v54 }
 0x1d6   :  { %v401_v55 = vsel %vm31_vm0, %v395_v52, 0.0 }
 0x1d7   :  { %402 = vadd.xlane.f32.xlu2 %v401_v55  ;;  %v396_v57 = vmul.f32 %v800_v56, %v800_v56 }
 0x1d9   :  { %v404_v6 = vsel %vm31_vm0, %v396_v57, 0.0 }
 0x1da   :  { %v378_v58 = vpop.xlane.xlu1 %377  ;;  %405 = vadd.xlane.f32.xlu0 %v404_v6 }
 0x1db   :  { %v389_v15 = vmul.f32 %v385_v43, %v378_v58 }
 0x1dd   :  { %v805_v60 = vsub.f32 %v366_v38, %v389_v15 }
 0x1df   :  { %v397_v61 = vmul.f32 %v805_v60, %v805_v60 }
 0x1e1   :  { %v407_v62 = vsel %vm31_vm0, %v397_v61, 0.0 }
 0x1e2   :  { %408 = vadd.xlane.f32.xlu1 %v407_v62 }
 0x242   :  { %v400_v31 = vpop.xlane.xlu2 %399 }
 0x243   :  { %v410_v59 = vmul.f32 %v400_v31, %v385_v43 }
 0x245   :  { %v414_v63 = vadd.f32 1e-12, %v410_v59 }
 0x247   :  { %561 = vrsqrt.f32 %v414_v63  ;;  %vm424_vm0 = vweird.f32 %v414_v63 }
 0x24a   :  { %v403_v0 = vpop.xlane.xlu2 %402 }
 0x24b   :  { %v411_v1 = vmul.f32 %v403_v0, %v385_v43 }
 0x24d   :  { %v562_v2 = vpop.eup %561  ;;  %v415_v3 = vadd.f32 1e-12, %v411_v1  ;;  %v406_v4 = vpop.xlane.xlu0 %405 }
 0x24e   :  { %v419_v11 = vmul.f32 %v562_v2, %v414_v63  ;;  %v412_v5 = vmul.f32 %v406_v4, %v385_v43  ;;  %vm425_vm4 = vweird.f32 %v562_v2 }
 0x24f   :  { %563 = vrsqrt.f32 %v415_v3  ;;  %vm426_vm5 = vmor %vm424_vm0, %vm425_vm4  ;;  %vm434_vm8 = vweird.f32 %v415_v3 }
 0x250   :  { %v420_v26 = vmul.f32 %v562_v2, %v419_v11  ;;  %v416_v29 = vadd.f32 1e-12, %v412_v5 }
 0x252   :  { %v421_v8 = vmul.f32 0.5, %v420_v26  ;;  %565 = vrsqrt.f32 %v416_v29  ;;  %vm444_vm11 = vweird.f32 %v416_v29 }
 0x254   :  { %v422_v9 = vsub.f32 1.5, %v421_v8 }
 0x255   :  { %v564_v12 = vpop.eup %563  ;;  %v409_v18 = vpop.xlane.xlu1 %408 }
 0x256   :  { %v423_v13 = vmul.f32 %v562_v2, %v422_v9  ;;  %v429_v7 = vmul.f32 %v564_v12, %v415_v3  ;;  %v413_v24 = vmul.f32 %v409_v18, %v385_v43  ;;  %vm435_vm6 = vweird.f32 %v564_v12 }
 0x257   :  { %vm436_vm9 = vmor %vm434_vm8, %vm435_vm6 }
 0x258   :  { %v427_v22 = vsel %vm426_vm5, %v562_v2, %v423_v13  ;;  %v430_v17 = vmul.f32 %v564_v12, %v429_v7  ;;  %v566_v27 = vpop.eup %565  ;;  %v417_v30 = vadd.f32 1e-12, %v413_v24 }
 0x259   :  { %v458_v23 = vmul.f32 %v427_v22, %v390_v48  ;;  %v439_v33 = vmul.f32 %v566_v27, %v416_v29  ;;  %vm445_vm10 = vweird.f32 %v566_v27 }
 0x25a   :  { %v431_v25 = vmul.f32 0.5, %v430_v17  ;;  %567 = vrsqrt.f32 %v417_v30  ;;  %vm446_vm12 = vmor %vm444_vm11, %vm445_vm10  ;;  %vm454_vm14 = vweird.f32 %v417_v30 }
 0x25b   :  { %v466_v28 = vmul.f32 %v549_v14, %v458_v23  ;;  %v440_v35 = vmul.f32 %v566_v27, %v439_v33 }
 0x25c   :  { %v432_v32 = vsub.f32 1.5, %v431_v25 }
 0x25d   :  { %v474_v21 = vadd.f32 %v550_v19, %v466_v28  ;;  %v441_v38 = vmul.f32 0.5, %v440_v35 }
 0x25e   :  { %v433_v34 = vmul.f32 %v564_v12, %v432_v32 }
 0x25f   :  { %v478_v36 = vpack.c.bf16 %v474_v21, %v474_v21  ;;  %v442_v41 = vsub.f32 1.5, %v441_v38 }
 0x260   :  { %v437_v37 = vsel %vm436_vm9, %v564_v12, %v433_v34  ;;  %v568_v39 = vpop.eup %567 }
 0x261   :  { %483 = vst.msk [vmem:[%s842_s7] sm:$0xf] %vm482_vm7, %v478_v36  ;;  %v459_v40 = vmul.f32 %v437_v37, %v795_v51  ;;  %v443_v44 = vmul.f32 %v566_v27, %v442_v41  ;;  %v449_v45 = vmul.f32 %v568_v39, %v417_v30  ;;  %vm455_vm13 = vweird.f32 %v568_v39 }
 0x262   :  { %vm456_vm15 = vmor %vm454_vm14, %vm455_vm13 }
 0x263   :  { %v467_v42 = vmul.f32 %v549_v14, %v459_v40  ;;  %v447_v43 = vsel %vm446_vm12, %v566_v27, %v443_v44  ;;  %v450_v47 = vmul.f32 %v568_v39, %v449_v45 }
 0x264   :  { %v460_v48 = vmul.f32 %v447_v43, %v800_v56 }
 0x265   :  { %v475_v46 = vadd.f32 %v550_v19, %v467_v42  ;;  %v451_v49 = vmul.f32 0.5, %v450_v47 }
 0x266   :  { %v468_v50 = vmul.f32 %v549_v14, %v460_v48 }
 0x267   :  { %v479_v20 = vpack.c.bf16 %v475_v46, %v475_v46  ;;  %v452_v16 = vsub.f32 1.5, %v451_v49 }
 0x268   :  { %v476_v10 = vadd.f32 %v550_v19, %v468_v50 }
 0x269   :  { %484 = vst.msk [vmem:[%s842_s7 + $0x4] sm:$0xf] %vm482_vm7, %v479_v20  ;;  %v453_v51 = vmul.f32 %v568_v39, %v452_v16 }
 0x26a   :  { %v480_v52 = vpack.c.bf16 %v476_v10, %v476_v10 }
 0x26b   :  { %v457_v53 = vsel %vm456_vm15, %v568_v39, %v453_v51 }
 0x26c   :  { %485 = vst.msk [vmem:[%s842_s7 + $0x8] sm:$0xf] %vm482_vm7, %v480_v52  ;;  %v461_v54 = vmul.f32 %v457_v53, %v805_v60 }
 0x26e   :  { %v469_v55 = vmul.f32 %v549_v14, %v461_v54 }
 0x270   :  { %v477_v56 = vadd.f32 %v550_v19, %v469_v55 }
 0x272   :  { %v481_v57 = vpack.c.bf16 %v477_v56, %v477_v56 }
 0x274   :  { %486 = vst.msk [vmem:[%s842_s7 + $0xc] sm:$0xf] %vm482_vm7, %v481_v57 }

</bundles_post_ra>
